<compile_context>
chip_gen: v7x
topology: tpu7x:2x2x1
jax: 0.10.0
libtpu: 0.0.40
codegen_flags: <defaults>
</compile_context>

<pallas_src>
import functools

import jax
import jax.numpy as jnp
from jax.experimental import pallas as pl
from jax.experimental.pallas import tpu as pltpu

NEG_SLOPE = 0.01  # nn.LeakyReLU() default
BN_EPS = 1e-5


def _leaky(x):
    return jnp.where(x >= 0, x, NEG_SLOPE * x)


def aspp_kernel(H, W, Cin, Cout, TH, DR, DC, dilations,
                x_ref,       # (1, H, W, Cin)        this image (matmul dtype)
                w1_ref,      # (Cin, Cout)           1x1 map conv (map_bn scale folded)
                wd_ref,      # (3, 3, 3, Cin, Cout)  dilated convs (map_bn scale folded)
                mshift_ref,  # (4, Cout) f32         map_bn shift per branch
                wred_ref,    # (4, Cout, Cout)       red_conv blocks (red_bn scale folded)
                pb_ref,      # (1, 1, Cout) f32      pool branch * red_scale + red_shift
                o_ref,       # (1, TH*W, Cout) f32   this row tile
                xpad_ref):   # (H+2*DR, W+2*DC, Cin) zero-haloed staging scratch
    t = pl.program_id(1)
    THW = TH * W
    mxu_dtype = x_ref.dtype

    # Stage the unpadded image into the zero-haloed VMEM scratch once per
    # image (the row-tile axis is 'arbitrary', so t runs 0..T-1 in order).
    @pl.when(t == 0)
    def _stage():
        xpad_ref[...] = jnp.zeros(xpad_ref.shape, xpad_ref.dtype)
        xpad_ref[DR:DR + H, DC:DC + W, :] = x_ref[0]

    r0 = pl.multiple_of(t * TH, TH)       # first output row of this tile

    # Centre slab (offset (0, 0)): shared by the 1x1 branch and the centre
    # tap of every dilated branch.  Contiguous slice of x -> cheap reshape.
    x_c = x_ref[0, pl.ds(r0, TH), :, :].reshape(THW, Cin)

    def fold_branch(branch_acc, b):
        # map_bn shift + LeakyReLU, then immediately contract with this
        # branch's (Cout, Cout) block of red_conv -> no (HW, 4*Cout) concat.
        h = _leaky(branch_acc + mshift_ref[b:b + 1, :])
        return jnp.dot(h.astype(mxu_dtype), wred_ref[b],
                       preferred_element_type=jnp.float32)

    # Branch 0: 1x1 conv.
    out = fold_branch(
        jnp.dot(x_c, w1_ref[...], preferred_element_type=jnp.float32), 0)

    # Branches 1..3: dilated 3x3 convs as shifted 1x1 matmuls over the
    # zero-haloed scratch.  Taps that fall entirely into the zero padding
    # are skipped at trace time.
    for i, d in enumerate(dilations):
        acc = jnp.dot(x_c, wd_ref[i, 1, 1], preferred_element_type=jnp.float32)
        for ky in range(3):
            for kx in range(3):
                if ky == 1 and kx == 1:
                    continue
                dy, dx = d * (ky - 1), d * (kx - 1)
                if abs(dy) >= H or abs(dx) >= W:
                    continue          # tap only ever reads zero padding
                slab = xpad_ref[pl.ds(DR + r0 + dy, TH),
                                DC + dx:DC + dx + W, :].reshape(THW, Cin)
                acc = acc + jnp.dot(slab, wd_ref[i, ky, kx],
                                    preferred_element_type=jnp.float32)
        out = out + fold_branch(acc, i + 1)

    # + broadcast pooled branch (red_bn scale/shift already folded into it),
    # final LeakyReLU.
    out = _leaky(out + pb_ref[0])
    o_ref[...] = out.reshape(1, THW, Cout).astype(o_ref.dtype)


def aspp_forward(x, params, dilations=(12, 24, 36), row_tile=8,
                 mxu_dtype=jnp.bfloat16):
    """x: (N, H, W, Cin) float32.  Returns (N, H, W, Cout) float32."""
    N, H, W, Cin = x.shape
    Cout = params["w1"].shape[1]

    if H % row_tile != 0:
        row_tile = H
    TH = row_tile
    T = H // TH
    THW = TH * W

    # In-kernel VMEM halo: only dilations that can reach real data need one.
    DR = max([d for d in dilations if d < H], default=0)
    DC = max([d for d in dilations if d < W], default=0)

    # ---- fold BN scales into conv weights (wrapper-side, once) -------------
    ms = params["map_scale"][0]                        # (4*Cout,)
    rs = params["red_scale"][0]                        # (Cout,)
    w1f = params["w1"] * ms[:Cout][None, :]
    wdf = params["wd"] * ms[Cout:].reshape(3, 1, 1, 1, Cout)
    wredf = params["wred"].reshape(4, Cout, Cout) * rs[None, None, :]
    mshift4 = params["map_shift"][0].reshape(4, Cout).astype(jnp.float32)

    # ---- global-pooling branch, hoisted to plain JAX (O(N*Cin*Cout)) -------
    pool = jnp.mean(x, axis=(1, 2))                                   # (N, Cin)
    pool = pool @ params["wgp"]                                       # (N, Cout)
    pool = _leaky(pool * params["gp_scale"][0] + params["gp_shift"][0])
    pool = pool @ params["wpred"]
    pb = (pool * rs + params["red_shift"][0]).reshape(N, 1, Cout)
    pb = pb.astype(jnp.float32)

    # ---- MXU operand dtype; accumulation + BN/LeakyReLU stay f32 -----------
    x_k = x.astype(mxu_dtype)
    w1f = w1f.astype(mxu_dtype)
    wdf = wdf.astype(mxu_dtype)
    wredf = wredf.astype(mxu_dtype)

    # TODO(synk): for large Cin (e.g. 2048) wd should stay in HBM
    # (memory_space=pl.ANY) and be streamed / Cin-tiled with make_async_copy;
    # at these sizes it is kept VMEM-resident.
    # TODO(synk): for very small Cout the output store is lane-sparse (Cout
    # lanes); a (W*Cout)-packed store would densify it but needs a
    # sublane->lane relayout in-kernel.
    kernel = functools.partial(aspp_kernel, H, W, Cin, Cout, TH, DR, DC,
                               tuple(dilations))

    in_specs = [
        # whole (unpadded) image per batch element; the block index is
        # constant across the row-tile axis so it is DMA'd once per image
        # and stays resident across that image's tiles.
        pl.BlockSpec((1, H, W, Cin), lambda n, t: (n, 0, 0, 0)),
        pl.BlockSpec((Cin, Cout), lambda n, t: (0, 0)),
        pl.BlockSpec((3, 3, 3, Cin, Cout), lambda n, t: (0, 0, 0, 0, 0)),
        pl.BlockSpec((4, Cout), lambda n, t: (0, 0)),
        pl.BlockSpec((4, Cout, Cout), lambda n, t: (0, 0, 0)),
        pl.BlockSpec((1, 1, Cout), lambda n, t: (n, 0, 0)),
    ]
    out_specs = pl.BlockSpec((1, THW, Cout), lambda n, t: (n, t, 0))

    out = pl.pallas_call(
        kernel,
        out_shape=jax.ShapeDtypeStruct((N, H * W, Cout), jnp.float32),
        grid_spec=pltpu.PrefetchScalarGridSpec(
            num_scalar_prefetch=0,
            grid=(N, T),
            in_specs=in_specs,
            out_specs=out_specs,
            scratch_shapes=[
                pltpu.VMEM((H + 2 * DR, W + 2 * DC, Cin), mxu_dtype)],
        ),
        compiler_params=pltpu.CompilerParams(
            # batch axis shards across TensorCores (v7x megacore); the
            # row-tile axis must stay sequential (per-image staging at t==0).
            dimension_semantics=("parallel", "arbitrary"),
            vmem_limit_bytes=32 * 1024 * 1024,
        ),
    )(x_k, w1f, wdf, mshift4, wredf, pb)

    return out.reshape(N, H, W, Cout)


# ---------------- pure-JAX reference (for correctness check only) ------------
def aspp_reference(x, params, dilations=(12, 24, 36)):
    def conv1x1(inp, w):
        return jnp.einsum("nhwc,co->nhwo", inp, w)

    def conv3x3_dil(inp, w, d):
        return jax.lax.conv_general_dilated(
            inp, w, window_strides=(1, 1), padding=((d, d), (d, d)),
            rhs_dilation=(d, d), dimension_numbers=("NHWC", "HWIO", "NHWC"))

    outs = [conv1x1(x, params["w1"])]
    for i, d in enumerate(dilations):
        outs.append(conv3x3_dil(x, params["wd"][i], d))
    out = jnp.concatenate(outs, axis=-1)
    out = _leaky(out * params["map_scale"][0] + params["map_shift"][0])
    out = conv1x1(out, params["wred"])

    pool = jnp.mean(x, axis=(1, 2), keepdims=True)
    pool = conv1x1(pool, params["wgp"])
    pool = _leaky(pool * params["gp_scale"][0] + params["gp_shift"][0])
    pool = conv1x1(pool, params["wpred"])

    out = out + pool
    out = _leaky(out * params["red_scale"][0] + params["red_shift"][0])
    return out


def _folded_bn(kg, kb, km, kv, c):
    gamma = 1.0 + 0.1 * jax.random.normal(kg, (c,), jnp.float32)
    beta = 0.1 * jax.random.normal(kb, (c,), jnp.float32)
    mean = 0.1 * jax.random.normal(km, (c,), jnp.float32)
    var = 1.0 + 0.1 * jnp.abs(jax.random.normal(kv, (c,), jnp.float32))
    scale = gamma / jnp.sqrt(var + BN_EPS)
    shift = beta - mean * scale
    return scale.reshape(1, c), shift.reshape(1, c)


if __name__ == "__main__":
    key = jax.random.PRNGKey(0)
    N, H, W = 2, 16, 16
    Cin, Cout = 4, 4
    dilations = (12, 24, 36)

    ks = jax.random.split(key, 20)
    x = jax.random.normal(ks[0], (N, H, W, Cin), jnp.float32)

    params = {}
    params["w1"] = 0.1 * jax.random.normal(ks[1], (Cin, Cout), jnp.float32)
    params["wd"] = 0.1 * jax.random.normal(ks[2], (3, 3, 3, Cin, Cout), jnp.float32)
    params["wred"] = 0.1 * jax.random.normal(ks[3], (4 * Cout, Cout), jnp.float32)
    params["wgp"] = 0.1 * jax.random.normal(ks[4], (Cin, Cout), jnp.float32)
    params["wpred"] = 0.1 * jax.random.normal(ks[5], (Cout, Cout), jnp.float32)
    params["map_scale"], params["map_shift"] = _folded_bn(ks[6], ks[7], ks[8], ks[9], 4 * Cout)
    params["gp_scale"], params["gp_shift"] = _folded_bn(ks[10], ks[11], ks[12], ks[13], Cout)
    params["red_scale"], params["red_shift"] = _folded_bn(ks[14], ks[15], ks[16], ks[17], Cout)

    y_ref = aspp_reference(x, params, dilations)

    # f32 MXU path: tight structural check against the f32 reference.
    y32 = aspp_forward(x, params, dilations, mxu_dtype=jnp.float32)
    jax.block_until_ready(y32)
    err32 = float(jnp.max(jnp.abs(y32 - y_ref)))
    assert err32 < 1e-3, f"f32 kernel mismatch vs reference, max abs err = {err32}"

    # bf16 MXU path (production config): tolerance covers bf16 operand rounding.
    y16 = aspp_forward(x, params, dilations, mxu_dtype=jnp.bfloat16)
    jax.block_until_ready(y16)
    err16 = float(jnp.max(jnp.abs(y16 - y_ref)))
    assert err16 < 5e-2, f"bf16 kernel mismatch vs reference, max abs err = {err16}"

    # TODO(synk): training-mode BatchNorm statistics and the
    # pooling_size != None avg-pool branch (dead code in this forward) are
    # not implemented.
    print("KERNEL_OK")
</pallas_src>

<mosaic_0001>
module attributes {stable_mosaic.version = 11 : i64} {
  func.func @aspp_kernel(%arg0: i32, %arg1: i32, %arg2: memref<1x16x16x4xf32, #tpu.memory_space<vmem>>, %arg3: memref<4x4xf32, #tpu.memory_space<vmem>>, %arg4: memref<3x3x3x4x4xf32, #tpu.memory_space<vmem>>, %arg5: memref<4x4xf32, #tpu.memory_space<vmem>>, %arg6: memref<4x4x4xf32, #tpu.memory_space<vmem>>, %arg7: memref<1x1x4xf32, #tpu.memory_space<vmem>>, %arg8: memref<1x128x4xf32, #tpu.memory_space<vmem>>, %arg9: memref<40x40x4xf32, #tpu.memory_space<vmem>>) attributes {dimension_semantics = [#tpu.dimension_semantics<parallel>, #tpu.dimension_semantics<arbitrary>], iteration_bounds = array<i64: 2, 2>, scalar_prefetch = 0 : i64, scratch_operands = 1 : i64, tpu.core_type = #tpu.core_type<tc>, window_params = [{transform_indices = @transform_0, window_bounds = array<i64: 1, 16, 16, 4>}, {pipeline_mode = #tpu.pipeline_mode<synchronous>, transform_indices = @transform_1, window_bounds = array<i64: 4, 4>}, {pipeline_mode = #tpu.pipeline_mode<synchronous>, transform_indices = @transform_2, window_bounds = array<i64: 3, 3, 3, 4, 4>}, {pipeline_mode = #tpu.pipeline_mode<synchronous>, transform_indices = @transform_3, window_bounds = array<i64: 4, 4>}, {pipeline_mode = #tpu.pipeline_mode<synchronous>, transform_indices = @transform_4, window_bounds = array<i64: 4, 4, 4>}, {transform_indices = @transform_5, window_bounds = array<i64: 1, 1, 4>}, {transform_indices = @transform_6, window_bounds = array<i64: 1, 128, 4>}]} {
    %c0_i32 = arith.constant 0 : i32
    %0 = arith.cmpi eq, %arg1, %c0_i32 : i32
    %1 = arith.extui %0 : i1 to i32
    %c0_i32_0 = arith.constant 0 : i32
    %2 = arith.cmpi ne, %1, %c0_i32_0 : i32
    scf.if %2 {
      %cst_136 = arith.constant 0.000000e+00 : f32
      %150 = vector.broadcast %cst_136 : f32 to vector<40x40x4xf32>
      %c0_137 = arith.constant 0 : index
      %c0_138 = arith.constant 0 : index
      %c0_139 = arith.constant 0 : index
      %151 = vector.load %arg9[%c0_137, %c0_138, %c0_139] : memref<40x40x4xf32, #tpu.memory_space<vmem>>, vector<40x40x4xf32>
      tpu.vector_store %arg9[%c0_137, %c0_138, %c0_139], %150 {strides = array<i32>} : memref<40x40x4xf32, #tpu.memory_space<vmem>>, vector<40x40x4xf32>,
      %c0_140 = arith.constant 0 : index
      %c0_141 = arith.constant 0 : index
      %c0_142 = arith.constant 0 : index
      %c0_143 = arith.constant 0 : index
      %152 = vector.load %arg2[%c0_140, %c0_141, %c0_142, %c0_143] : memref<1x16x16x4xf32, #tpu.memory_space<vmem>>, vector<1x16x16x4xf32>
      %153 = vector.shape_cast %152 : vector<1x16x16x4xf32> to vector<16x16x4xf32>
      %c12_144 = arith.constant 12 : index
      %c12_145 = arith.constant 12 : index
      %c0_146 = arith.constant 0 : index
      %154 = vector.load %arg9[%c12_144, %c12_145, %c0_146] : memref<40x40x4xf32, #tpu.memory_space<vmem>>, vector<16x16x4xf32>
      tpu.vector_store %arg9[%c12_144, %c12_145, %c0_146], %153 {strides = array<i32>} : memref<40x40x4xf32, #tpu.memory_space<vmem>>, vector<16x16x4xf32>,
    } else {
    }
    %c8_i32 = arith.constant 8 : i32
    %3 = arith.muli %arg1, %c8_i32 : i32
    %4 = tpu.assume_multiple %3, 8 : i32
    %c0 = arith.constant 0 : index
    %5 = arith.index_cast %4 : i32 to index
    %c0_1 = arith.constant 0 : index
    %c0_2 = arith.constant 0 : index
    %6 = vector.load %arg2[%c0, %5, %c0_1, %c0_2] : memref<1x16x16x4xf32, #tpu.memory_space<vmem>>, vector<1x8x16x4xf32>
    %7 = vector.shape_cast %6 : vector<1x8x16x4xf32> to vector<8x16x4xf32>
    %8 = vector.shape_cast %7 : vector<8x16x4xf32> to vector<128x4xf32>
    %c0_3 = arith.constant 0 : index
    %c0_4 = arith.constant 0 : index
    %9 = vector.load %arg3[%c0_3, %c0_4] : memref<4x4xf32, #tpu.memory_space<vmem>>, vector<4x4xf32>
    %cst = arith.constant dense<0.000000e+00> : vector<128x4xf32>
    %10 = tpu.matmul %8, %9, %cst {dimension_numbers = #tpu.dot_dimension_numbers<[1], [0], [0], [1], [0, 0, 1, 1], [], []>} : vector<128x4xf32>, vector<4x4xf32>, vector<128x4xf32> -> vector<128x4xf32>
    %c0_5 = arith.constant 0 : index
    %c0_6 = arith.constant 0 : index
    %11 = vector.load %arg5[%c0_5, %c0_6] : memref<4x4xf32, #tpu.memory_space<vmem>>, vector<1x4xf32>
    %12 = vector.broadcast %11 : vector<1x4xf32> to vector<128x4xf32>
    %13 = arith.addf %10, %12 : vector<128x4xf32>
    %cst_7 = arith.constant 0.000000e+00 : f32
    %14 = vector.broadcast %cst_7 : f32 to vector<128x4xf32>
    %15 = arith.cmpf oge, %13, %14 : vector<128x4xf32>
    %cst_8 = arith.constant 0.00999999977 : f32
    %16 = vector.broadcast %cst_8 : f32 to vector<128x4xf32>
    %17 = arith.mulf %16, %13 : vector<128x4xf32>
    %18 = arith.select %15, %13, %17 : vector<128x4xi1>, vector<128x4xf32>
    %c0_9 = arith.constant 0 : index
    %c0_10 = arith.constant 0 : index
    %c0_11 = arith.constant 0 : index
    %19 = vector.load %arg6[%c0_9, %c0_10, %c0_11] : memref<4x4x4xf32, #tpu.memory_space<vmem>>, vector<1x4x4xf32>
    %20 = vector.shape_cast %19 : vector<1x4x4xf32> to vector<4x4xf32>
    %cst_12 = arith.constant dense<0.000000e+00> : vector<128x4xf32>
    %21 = tpu.matmul %18, %20, %cst_12 {dimension_numbers = #tpu.dot_dimension_numbers<[1], [0], [0], [1], [0, 0, 1, 1], [], []>} : vector<128x4xf32>, vector<4x4xf32>, vector<128x4xf32> -> vector<128x4xf32>
    %c0_13 = arith.constant 0 : index
    %c1 = arith.constant 1 : index
    %c1_14 = arith.constant 1 : index
    %c0_15 = arith.constant 0 : index
    %c0_16 = arith.constant 0 : index
    %22 = vector.load %arg4[%c0_13, %c1, %c1_14, %c0_15, %c0_16] : memref<3x3x3x4x4xf32, #tpu.memory_space<vmem>>, vector<1x1x1x4x4xf32>
    %23 = vector.shape_cast %22 : vector<1x1x1x4x4xf32> to vector<4x4xf32>
    %cst_17 = arith.constant dense<0.000000e+00> : vector<128x4xf32>
    %24 = tpu.matmul %8, %23, %cst_17 {dimension_numbers = #tpu.dot_dimension_numbers<[1], [0], [0], [1], [0, 0, 1, 1], [], []>} : vector<128x4xf32>, vector<4x4xf32>, vector<128x4xf32> -> vector<128x4xf32>
    %c12_i32 = arith.constant 12 : i32
    %25 = arith.addi %c12_i32, %4 : i32
    %c-12_i32 = arith.constant -12 : i32
    %26 = arith.addi %25, %c-12_i32 : i32
    %27 = arith.index_cast %26 : i32 to index
    %c0_18 = arith.constant 0 : index
    %c0_19 = arith.constant 0 : index
    %28 = vector.load %arg9[%27, %c0_18, %c0_19] : memref<40x40x4xf32, #tpu.memory_space<vmem>>, vector<8x16x4xf32>
    %29 = vector.shape_cast %28 : vector<8x16x4xf32> to vector<128x4xf32>
    %c0_20 = arith.constant 0 : index
    %c0_21 = arith.constant 0 : index
    %c0_22 = arith.constant 0 : index
    %c0_23 = arith.constant 0 : index
    %c0_24 = arith.constant 0 : index
    %30 = vector.load %arg4[%c0_20, %c0_21, %c0_22, %c0_23, %c0_24] : memref<3x3x3x4x4xf32, #tpu.memory_space<vmem>>, vector<1x1x1x4x4xf32>
    %31 = vector.shape_cast %30 : vector<1x1x1x4x4xf32> to vector<4x4xf32>
    %cst_25 = arith.constant dense<0.000000e+00> : vector<128x4xf32>
    %32 = tpu.matmul %29, %31, %cst_25 {dimension_numbers = #tpu.dot_dimension_numbers<[1], [0], [0], [1], [0, 0, 1, 1], [], []>} : vector<128x4xf32>, vector<4x4xf32>, vector<128x4xf32> -> vector<128x4xf32>
    %33 = arith.addf %24, %32 : vector<128x4xf32>
    %c12_i32_26 = arith.constant 12 : i32
    %34 = arith.addi %c12_i32_26, %4 : i32
    %c-12_i32_27 = arith.constant -12 : i32
    %35 = arith.addi %34, %c-12_i32_27 : i32
    %36 = arith.index_cast %35 : i32 to index
    %c12 = arith.constant 12 : index
    %c0_28 = arith.constant 0 : index
    %37 = vector.load %arg9[%36, %c12, %c0_28] : memref<40x40x4xf32, #tpu.memory_space<vmem>>, vector<8x16x4xf32>
    %38 = vector.shape_cast %37 : vector<8x16x4xf32> to vector<128x4xf32>
    %c0_29 = arith.constant 0 : index
    %c0_30 = arith.constant 0 : index
    %c1_31 = arith.constant 1 : index
    %c0_32 = arith.constant 0 : index
    %c0_33 = arith.constant 0 : index
    %39 = vector.load %arg4[%c0_29, %c0_30, %c1_31, %c0_32, %c0_33] : memref<3x3x3x4x4xf32, #tpu.memory_space<vmem>>, vector<1x1x1x4x4xf32>
    %40 = vector.shape_cast %39 : vector<1x1x1x4x4xf32> to vector<4x4xf32>
    %cst_34 = arith.constant dense<0.000000e+00> : vector<128x4xf32>
    %41 = tpu.matmul %38, %40, %cst_34 {dimension_numbers = #tpu.dot_dimension_numbers<[1], [0], [0], [1], [0, 0, 1, 1], [], []>} : vector<128x4xf32>, vector<4x4xf32>, vector<128x4xf32> -> vector<128x4xf32>
    %42 = arith.addf %33, %41 : vector<128x4xf32>
    %c12_i32_35 = arith.constant 12 : i32
    %43 = arith.addi %c12_i32_35, %4 : i32
    %c-12_i32_36 = arith.constant -12 : i32
    %44 = arith.addi %43, %c-12_i32_36 : i32
    %45 = arith.index_cast %44 : i32 to index
    %c24 = arith.constant 24 : index
    %c0_37 = arith.constant 0 : index
    %46 = vector.load %arg9[%45, %c24, %c0_37] : memref<40x40x4xf32, #tpu.memory_space<vmem>>, vector<8x16x4xf32>
    %47 = vector.shape_cast %46 : vector<8x16x4xf32> to vector<128x4xf32>
    %c0_38 = arith.constant 0 : index
    %c0_39 = arith.constant 0 : index
    %c2 = arith.constant 2 : index
    %c0_40 = arith.constant 0 : index
    %c0_41 = arith.constant 0 : index
    %48 = vector.load %arg4[%c0_38, %c0_39, %c2, %c0_40, %c0_41] : memref<3x3x3x4x4xf32, #tpu.memory_space<vmem>>, vector<1x1x1x4x4xf32>
    %49 = vector.shape_cast %48 : vector<1x1x1x4x4xf32> to vector<4x4xf32>
    %cst_42 = arith.constant dense<0.000000e+00> : vector<128x4xf32>
    %50 = tpu.matmul %47, %49, %cst_42 {dimension_numbers = #tpu.dot_dimension_numbers<[1], [0], [0], [1], [0, 0, 1, 1], [], []>} : vector<128x4xf32>, vector<4x4xf32>, vector<128x4xf32> -> vector<128x4xf32>
    %51 = arith.addf %42, %50 : vector<128x4xf32>
    %c12_i32_43 = arith.constant 12 : i32
    %52 = arith.addi %c12_i32_43, %4 : i32
    %c0_i32_44 = arith.constant 0 : i32
    %53 = arith.addi %52, %c0_i32_44 : i32
    %54 = arith.index_cast %53 : i32 to index
    %c0_45 = arith.constant 0 : index
    %c0_46 = arith.constant 0 : index
    %55 = vector.load %arg9[%54, %c0_45, %c0_46] : memref<40x40x4xf32, #tpu.memory_space<vmem>>, vector<8x16x4xf32>
    %56 = vector.shape_cast %55 : vector<8x16x4xf32> to vector<128x4xf32>
    %c0_47 = arith.constant 0 : index
    %c1_48 = arith.constant 1 : index
    %c0_49 = arith.constant 0 : index
    %c0_50 = arith.constant 0 : index
    %c0_51 = arith.constant 0 : index
    %57 = vector.load %arg4[%c0_47, %c1_48, %c0_49, %c0_50, %c0_51] : memref<3x3x3x4x4xf32, #tpu.memory_space<vmem>>, vector<1x1x1x4x4xf32>
    %58 = vector.shape_cast %57 : vector<1x1x1x4x4xf32> to vector<4x4xf32>
    %cst_52 = arith.constant dense<0.000000e+00> : vector<128x4xf32>
    %59 = tpu.matmul %56, %58, %cst_52 {dimension_numbers = #tpu.dot_dimension_numbers<[1], [0], [0], [1], [0, 0, 1, 1], [], []>} : vector<128x4xf32>, vector<4x4xf32>, vector<128x4xf32> -> vector<128x4xf32>
    %60 = arith.addf %51, %59 : vector<128x4xf32>
    %c12_i32_53 = arith.constant 12 : i32
    %61 = arith.addi %c12_i32_53, %4 : i32
    %c0_i32_54 = arith.constant 0 : i32
    %62 = arith.addi %61, %c0_i32_54 : i32
    %63 = arith.index_cast %62 : i32 to index
    %c24_55 = arith.constant 24 : index
    %c0_56 = arith.constant 0 : index
    %64 = vector.load %arg9[%63, %c24_55, %c0_56] : memref<40x40x4xf32, #tpu.memory_space<vmem>>, vector<8x16x4xf32>
    %65 = vector.shape_cast %64 : vector<8x16x4xf32> to vector<128x4xf32>
    %c0_57 = arith.constant 0 : index
    %c1_58 = arith.constant 1 : index
    %c2_59 = arith.constant 2 : index
    %c0_60 = arith.constant 0 : index
    %c0_61 = arith.constant 0 : index
    %66 = vector.load %arg4[%c0_57, %c1_58, %c2_59, %c0_60, %c0_61] : memref<3x3x3x4x4xf32, #tpu.memory_space<vmem>>, vector<1x1x1x4x4xf32>
    %67 = vector.shape_cast %66 : vector<1x1x1x4x4xf32> to vector<4x4xf32>
    %cst_62 = arith.constant dense<0.000000e+00> : vector<128x4xf32>
    %68 = tpu.matmul %65, %67, %cst_62 {dimension_numbers = #tpu.dot_dimension_numbers<[1], [0], [0], [1], [0, 0, 1, 1], [], []>} : vector<128x4xf32>, vector<4x4xf32>, vector<128x4xf32> -> vector<128x4xf32>
    %69 = arith.addf %60, %68 : vector<128x4xf32>
    %c12_i32_63 = arith.constant 12 : i32
    %70 = arith.addi %c12_i32_63, %4 : i32
    %c12_i32_64 = arith.constant 12 : i32
    %71 = arith.addi %70, %c12_i32_64 : i32
    %72 = arith.index_cast %71 : i32 to index
    %c0_65 = arith.constant 0 : index
    %c0_66 = arith.constant 0 : index
    %73 = vector.load %arg9[%72, %c0_65, %c0_66] : memref<40x40x4xf32, #tpu.memory_space<vmem>>, vector<8x16x4xf32>
    %74 = vector.shape_cast %73 : vector<8x16x4xf32> to vector<128x4xf32>
    %c0_67 = arith.constant 0 : index
    %c2_68 = arith.constant 2 : index
    %c0_69 = arith.constant 0 : index
    %c0_70 = arith.constant 0 : index
    %c0_71 = arith.constant 0 : index
    %75 = vector.load %arg4[%c0_67, %c2_68, %c0_69, %c0_70, %c0_71] : memref<3x3x3x4x4xf32, #tpu.memory_space<vmem>>, vector<1x1x1x4x4xf32>
    %76 = vector.shape_cast %75 : vector<1x1x1x4x4xf32> to vector<4x4xf32>
    %cst_72 = arith.constant dense<0.000000e+00> : vector<128x4xf32>
    %77 = tpu.matmul %74, %76, %cst_72 {dimension_numbers = #tpu.dot_dimension_numbers<[1], [0], [0], [1], [0, 0, 1, 1], [], []>} : vector<128x4xf32>, vector<4x4xf32>, vector<128x4xf32> -> vector<128x4xf32>
    %78 = arith.addf %69, %77 : vector<128x4xf32>
    %c12_i32_73 = arith.constant 12 : i32
    %79 = arith.addi %c12_i32_73, %4 : i32
    %c12_i32_74 = arith.constant 12 : i32
    %80 = arith.addi %79, %c12_i32_74 : i32
    %81 = arith.index_cast %80 : i32 to index
    %c12_75 = arith.constant 12 : index
    %c0_76 = arith.constant 0 : index
    %82 = vector.load %arg9[%81, %c12_75, %c0_76] : memref<40x40x4xf32, #tpu.memory_space<vmem>>, vector<8x16x4xf32>
    %83 = vector.shape_cast %82 : vector<8x16x4xf32> to vector<128x4xf32>
    %c0_77 = arith.constant 0 : index
    %c2_78 = arith.constant 2 : index
    %c1_79 = arith.constant 1 : index
    %c0_80 = arith.constant 0 : index
    %c0_81 = arith.constant 0 : index
    %84 = vector.load %arg4[%c0_77, %c2_78, %c1_79, %c0_80, %c0_81] : memref<3x3x3x4x4xf32, #tpu.memory_space<vmem>>, vector<1x1x1x4x4xf32>
    %85 = vector.shape_cast %84 : vector<1x1x1x4x4xf32> to vector<4x4xf32>
    %cst_82 = arith.constant dense<0.000000e+00> : vector<128x4xf32>
    %86 = tpu.matmul %83, %85, %cst_82 {dimension_numbers = #tpu.dot_dimension_numbers<[1], [0], [0], [1], [0, 0, 1, 1], [], []>} : vector<128x4xf32>, vector<4x4xf32>, vector<128x4xf32> -> vector<128x4xf32>
    %87 = arith.addf %78, %86 : vector<128x4xf32>
    %c12_i32_83 = arith.constant 12 : i32
    %88 = arith.addi %c12_i32_83, %4 : i32
    %c12_i32_84 = arith.constant 12 : i32
    %89 = arith.addi %88, %c12_i32_84 : i32
    %90 = arith.index_cast %89 : i32 to index
    %c24_85 = arith.constant 24 : index
    %c0_86 = arith.constant 0 : index
    %91 = vector.load %arg9[%90, %c24_85, %c0_86] : memref<40x40x4xf32, #tpu.memory_space<vmem>>, vector<8x16x4xf32>
    %92 = vector.shape_cast %91 : vector<8x16x4xf32> to vector<128x4xf32>
    %c0_87 = arith.constant 0 : index
    %c2_88 = arith.constant 2 : index
    %c2_89 = arith.constant 2 : index
    %c0_90 = arith.constant 0 : index
    %c0_91 = arith.constant 0 : index
    %93 = vector.load %arg4[%c0_87, %c2_88, %c2_89, %c0_90, %c0_91] : memref<3x3x3x4x4xf32, #tpu.memory_space<vmem>>, vector<1x1x1x4x4xf32>
    %94 = vector.shape_cast %93 : vector<1x1x1x4x4xf32> to vector<4x4xf32>
    %cst_92 = arith.constant dense<0.000000e+00> : vector<128x4xf32>
    %95 = tpu.matmul %92, %94, %cst_92 {dimension_numbers = #tpu.dot_dimension_numbers<[1], [0], [0], [1], [0, 0, 1, 1], [], []>} : vector<128x4xf32>, vector<4x4xf32>, vector<128x4xf32> -> vector<128x4xf32>
    %96 = arith.addf %87, %95 : vector<128x4xf32>
    %c1_93 = arith.constant 1 : index
    %c0_94 = arith.constant 0 : index
    %97 = vector.load %arg5[%c1_93, %c0_94] : memref<4x4xf32, #tpu.memory_space<vmem>>, vector<1x4xf32>
    %98 = vector.broadcast %97 : vector<1x4xf32> to vector<128x4xf32>
    %99 = arith.addf %96, %98 : vector<128x4xf32>
    %cst_95 = arith.constant 0.000000e+00 : f32
    %100 = vector.broadcast %cst_95 : f32 to vector<128x4xf32>
    %101 = arith.cmpf oge, %99, %100 : vector<128x4xf32>
    %cst_96 = arith.constant 0.00999999977 : f32
    %102 = vector.broadcast %cst_96 : f32 to vector<128x4xf32>
    %103 = arith.mulf %102, %99 : vector<128x4xf32>
    %104 = arith.select %101, %99, %103 : vector<128x4xi1>, vector<128x4xf32>
    %c1_97 = arith.constant 1 : index
    %c0_98 = arith.constant 0 : index
    %c0_99 = arith.constant 0 : index
    %105 = vector.load %arg6[%c1_97, %c0_98, %c0_99] : memref<4x4x4xf32, #tpu.memory_space<vmem>>, vector<1x4x4xf32>
    %106 = vector.shape_cast %105 : vector<1x4x4xf32> to vector<4x4xf32>
    %cst_100 = arith.constant dense<0.000000e+00> : vector<128x4xf32>
    %107 = tpu.matmul %104, %106, %cst_100 {dimension_numbers = #tpu.dot_dimension_numbers<[1], [0], [0], [1], [0, 0, 1, 1], [], []>} : vector<128x4xf32>, vector<4x4xf32>, vector<128x4xf32> -> vector<128x4xf32>
    %108 = arith.addf %21, %107 : vector<128x4xf32>
    %c1_101 = arith.constant 1 : index
    %c1_102 = arith.constant 1 : index
    %c1_103 = arith.constant 1 : index
    %c0_104 = arith.constant 0 : index
    %c0_105 = arith.constant 0 : index
    %109 = vector.load %arg4[%c1_101, %c1_102, %c1_103, %c0_104, %c0_105] : memref<3x3x3x4x4xf32, #tpu.memory_space<vmem>>, vector<1x1x1x4x4xf32>
    %110 = vector.shape_cast %109 : vector<1x1x1x4x4xf32> to vector<4x4xf32>
    %cst_106 = arith.constant dense<0.000000e+00> : vector<128x4xf32>
    %111 = tpu.matmul %8, %110, %cst_106 {dimension_numbers = #tpu.dot_dimension_numbers<[1], [0], [0], [1], [0, 0, 1, 1], [], []>} : vector<128x4xf32>, vector<4x4xf32>, vector<128x4xf32> -> vector<128x4xf32>
    %c2_107 = arith.constant 2 : index
    %c0_108 = arith.constant 0 : index
    %112 = vector.load %arg5[%c2_107, %c0_108] : memref<4x4xf32, #tpu.memory_space<vmem>>, vector<1x4xf32>
    %113 = vector.broadcast %112 : vector<1x4xf32> to vector<128x4xf32>
    %114 = arith.addf %111, %113 : vector<128x4xf32>
    %cst_109 = arith.constant 0.000000e+00 : f32
    %115 = vector.broadcast %cst_109 : f32 to vector<128x4xf32>
    %116 = arith.cmpf oge, %114, %115 : vector<128x4xf32>
    %cst_110 = arith.constant 0.00999999977 : f32
    %117 = vector.broadcast %cst_110 : f32 to vector<128x4xf32>
    %118 = arith.mulf %117, %114 : vector<128x4xf32>
    %119 = arith.select %116, %114, %118 : vector<128x4xi1>, vector<128x4xf32>
    %c2_111 = arith.constant 2 : index
    %c0_112 = arith.constant 0 : index
    %c0_113 = arith.constant 0 : index
    %120 = vector.load %arg6[%c2_111, %c0_112, %c0_113] : memref<4x4x4xf32, #tpu.memory_space<vmem>>, vector<1x4x4xf32>
    %121 = vector.shape_cast %120 : vector<1x4x4xf32> to vector<4x4xf32>
    %cst_114 = arith.constant dense<0.000000e+00> : vector<128x4xf32>
    %122 = tpu.matmul %119, %121, %cst_114 {dimension_numbers = #tpu.dot_dimension_numbers<[1], [0], [0], [1], [0, 0, 1, 1], [], []>} : vector<128x4xf32>, vector<4x4xf32>, vector<128x4xf32> -> vector<128x4xf32>
    %123 = arith.addf %108, %122 : vector<128x4xf32>
    %c2_115 = arith.constant 2 : index
    %c1_116 = arith.constant 1 : index
    %c1_117 = arith.constant 1 : index
    %c0_118 = arith.constant 0 : index
    %c0_119 = arith.constant 0 : index
    %124 = vector.load %arg4[%c2_115, %c1_116, %c1_117, %c0_118, %c0_119] : memref<3x3x3x4x4xf32, #tpu.memory_space<vmem>>, vector<1x1x1x4x4xf32>
    %125 = vector.shape_cast %124 : vector<1x1x1x4x4xf32> to vector<4x4xf32>
    %cst_120 = arith.constant dense<0.000000e+00> : vector<128x4xf32>
    %126 = tpu.matmul %8, %125, %cst_120 {dimension_numbers = #tpu.dot_dimension_numbers<[1], [0], [0], [1], [0, 0, 1, 1], [], []>} : vector<128x4xf32>, vector<4x4xf32>, vector<128x4xf32> -> vector<128x4xf32>
    %c3 = arith.constant 3 : index
    %c0_121 = arith.constant 0 : index
    %127 = vector.load %arg5[%c3, %c0_121] : memref<4x4xf32, #tpu.memory_space<vmem>>, vector<1x4xf32>
    %128 = vector.broadcast %127 : vector<1x4xf32> to vector<128x4xf32>
    %129 = arith.addf %126, %128 : vector<128x4xf32>
    %cst_122 = arith.constant 0.000000e+00 : f32
    %130 = vector.broadcast %cst_122 : f32 to vector<128x4xf32>
    %131 = arith.cmpf oge, %129, %130 : vector<128x4xf32>
    %cst_123 = arith.constant 0.00999999977 : f32
    %132 = vector.broadcast %cst_123 : f32 to vector<128x4xf32>
    %133 = arith.mulf %132, %129 : vector<128x4xf32>
    %134 = arith.select %131, %129, %133 : vector<128x4xi1>, vector<128x4xf32>
    %c3_124 = arith.constant 3 : index
    %c0_125 = arith.constant 0 : index
    %c0_126 = arith.constant 0 : index
    %135 = vector.load %arg6[%c3_124, %c0_125, %c0_126] : memref<4x4x4xf32, #tpu.memory_space<vmem>>, vector<1x4x4xf32>
    %136 = vector.shape_cast %135 : vector<1x4x4xf32> to vector<4x4xf32>
    %cst_127 = arith.constant dense<0.000000e+00> : vector<128x4xf32>
    %137 = tpu.matmul %134, %136, %cst_127 {dimension_numbers = #tpu.dot_dimension_numbers<[1], [0], [0], [1], [0, 0, 1, 1], [], []>} : vector<128x4xf32>, vector<4x4xf32>, vector<128x4xf32> -> vector<128x4xf32>
    %138 = arith.addf %123, %137 : vector<128x4xf32>
    %c0_128 = arith.constant 0 : index
    %c0_129 = arith.constant 0 : index
    %c0_130 = arith.constant 0 : index
    %139 = vector.load %arg7[%c0_128, %c0_129, %c0_130] : memref<1x1x4xf32, #tpu.memory_space<vmem>>, vector<1x1x4xf32>
    %140 = vector.shape_cast %139 : vector<1x1x4xf32> to vector<1x4xf32>
    %141 = vector.broadcast %140 : vector<1x4xf32> to vector<128x4xf32>
    %142 = arith.addf %138, %141 : vector<128x4xf32>
    %cst_131 = arith.constant 0.000000e+00 : f32
    %143 = vector.broadcast %cst_131 : f32 to vector<128x4xf32>
    %144 = arith.cmpf oge, %142, %143 : vector<128x4xf32>
    %cst_132 = arith.constant 0.00999999977 : f32
    %145 = vector.broadcast %cst_132 : f32 to vector<128x4xf32>
    %146 = arith.mulf %145, %142 : vector<128x4xf32>
    %147 = arith.select %144, %142, %146 : vector<128x4xi1>, vector<128x4xf32>
    %148 = vector.shape_cast %147 : vector<128x4xf32> to vector<1x128x4xf32>
    %c0_133 = arith.constant 0 : index
    %c0_134 = arith.constant 0 : index
    %c0_135 = arith.constant 0 : index
    %149 = vector.load %arg8[%c0_133, %c0_134, %c0_135] : memref<1x128x4xf32, #tpu.memory_space<vmem>>, vector<1x128x4xf32>
    tpu.vector_store %arg8[%c0_133, %c0_134, %c0_135], %148 {strides = array<i32>} : memref<1x128x4xf32, #tpu.memory_space<vmem>>, vector<1x128x4xf32>,
    return
  }
  func.func @transform_0(%arg0: i32, %arg1: i32) -> (i32, i32, i32, i32) {
    %c0_i32 = arith.constant 0 : i32
    %c0_i32_0 = arith.constant 0 : i32
    %c0_i32_1 = arith.constant 0 : i32
    %c0_i32_2 = arith.constant 0 : i32
    return %arg0, %c0_i32, %c0_i32_0, %c0_i32_1 : i32, i32, i32, i32
  }
  func.func @transform_1(%arg0: i32, %arg1: i32) -> (i32, i32) {
    %c0_i32 = arith.constant 0 : i32
    %c0_i32_0 = arith.constant 0 : i32
    %c0_i32_1 = arith.constant 0 : i32
    return %c0_i32, %c0_i32_0 : i32, i32
  }
  func.func @transform_2(%arg0: i32, %arg1: i32) -> (i32, i32, i32, i32, i32) {
    %c0_i32 = arith.constant 0 : i32
    %c0_i32_0 = arith.constant 0 : i32
    %c0_i32_1 = arith.constant 0 : i32
    %c0_i32_2 = arith.constant 0 : i32
    %c0_i32_3 = arith.constant 0 : i32
    %c0_i32_4 = arith.constant 0 : i32
    return %c0_i32, %c0_i32_0, %c0_i32_1, %c0_i32_2, %c0_i32_3 : i32, i32, i32, i32, i32
  }
  func.func @transform_3(%arg0: i32, %arg1: i32) -> (i32, i32) {
    %c0_i32 = arith.constant 0 : i32
    %c0_i32_0 = arith.constant 0 : i32
    %c0_i32_1 = arith.constant 0 : i32
    return %c0_i32, %c0_i32_0 : i32, i32
  }
  func.func @transform_4(%arg0: i32, %arg1: i32) -> (i32, i32, i32) {
    %c0_i32 = arith.constant 0 : i32
    %c0_i32_0 = arith.constant 0 : i32
    %c0_i32_1 = arith.constant 0 : i32
    %c0_i32_2 = arith.constant 0 : i32
    return %c0_i32, %c0_i32_0, %c0_i32_1 : i32, i32, i32
  }
  func.func @transform_5(%arg0: i32, %arg1: i32) -> (i32, i32, i32) {
    %c0_i32 = arith.constant 0 : i32
    %c0_i32_0 = arith.constant 0 : i32
    %c0_i32_1 = arith.constant 0 : i32
    return %arg0, %c0_i32, %c0_i32_0 : i32, i32, i32
  }
  func.func @transform_6(%arg0: i32, %arg1: i32) -> (i32, i32, i32) {
    %c0_i32 = arith.constant 0 : i32
    %c0_i32_0 = arith.constant 0 : i32
    return %arg0, %arg1, %c0_i32 : i32, i32, i32
  }
}

</mosaic_0001>

<bundles_post_ra>
// kernel: tpu_custom_call.1
= control target key start
LH: loop header
LB: loop body
LE: loop exit
PB: predicated region body
PF: predicated region fallthrough
CT: control target
= control target key end

     0   :  { %s5690_s21 = smov 0   ;;  %s5692_s22 = smov 0   ;;  %s7081_s0 = inlined_call_operand.vmem [shape: f32[2,16,16,4], index: 0, kind: input, shape index: {}]   ;;  %s7082_s1 = inlined_call_operand.vmem [shape: f32[4,4], index: 1, kind: input, shape index: {}]   ;;  %s7083_s2 = inlined_call_operand.vmem [shape: f32[3,3,3,4,4], index: 2, kind: input, shape index: {}]   ;;  %s7084_s3 = inlined_call_operand.vmem [shape: f32[4,4], index: 3, kind: input, shape index: {}]   ;;  %s7085_s4 = inlined_call_operand.vmem [shape: f32[4,4,4], index: 4, kind: input, shape index: {}]   ;;  %s7086_s5 = inlined_call_operand.vmem [shape: f32[2,1,4], index: 5, kind: input, shape index: {}]   ;;  %s7087_s6 = inlined_call_operand.vmem [shape: f32[2,256,4], index: 6, kind: output, shape index: {}]  }
   0x1   :  { %s5694_s23 = smov 0   ;;  %s5696_s24 = smov 0  }
   0x2   :  { %s5698_s25 = smov 0  }
   0x3 LB: > { %s25_s26 = sadd.s32 1, %s5644_s23  ;;  %s28_s27 = sadd.s32 1, %s5648_s24  ;;  %s5652_s25 = sphi %s5698_s25, %s16_s25   ;;  %s5648_s24 = sphi %s5696_s24, %s7091_s24   ;;  %s5644_s23 = sphi %s5694_s23, %s7090_s23   ;;  %s5640_s22 = sphi %s5692_s22, %s7089_s22   ;;  %s5636_s21 = sphi %s5690_s21, %s7088_s21  }
   0x4   : > { %p26_p0 = scmp.ge.s32.totalorder %s25_s26, 2  ;;  %p4305_p1 = scmp.ge.s32.totalorder %s5652_s25, 1 }
   0x5   : > { %p234_p2 = scmp.lt.s32.totalorder %s5652_s25, 5 }
   0x6   : > { %s7093_s26 = smov (%p26_p0, %s25_s26), 0  ;;  %s7095_s27 = smov (!%p26_p0, %s28_s27), %s5648_s24 }
   0x7   : > { %p235_p3 = pnand %p4305_p1, %p234_p2  ;;  %p30_p4 = scmp.ge.s32.totalorder %s7095_s27, 2 }
   0x8   : > { %p271_p5 = scmp.lt.s32.totalorder (!%p235_p3), %s5640_s22, 1  ;;  %s4308_s28 = sshll.u32 (!%p235_p3), %s5636_s21, 4 }
   0x9   : > { %s7097_s27 = smov (%p30_p4, %s7095_s27), 0  ;;  %238 = sbr.rel (%p235_p3) target bundleno = 1365 (0x555), region = 44 }
   0xa   : > { %p282_p6 = scmp.lt.s32.totalorder (!%p235_p3), %s4308_s28, 31  ;;  %p4311_p7 = scmp.ne.s32.totalorder (!%p235_p3), %s5636_s21, 0 }
  0x10   : > { %s7099_s22 = smov (!%p271_p5, %s5640_s22), 1  ;;  %s7101_s28 = smov (!%p282_p6, %s4308_s28), 31 }
  0x11   : > { %s4691_s29 = sshll.u32 %s7099_s22, 8  ;;  %s278_s8 = scalar_lea.vmem %s7086_s5, %s7099_s22  ;;  %vm293_vm0 = vcmask (!%p4311_p7), 31744   ;;  %v5654_v3 = vmov (!%p4311_p7), 0.0  }
  0x12   : > { %s5733_s11 = scalar_lea.vmem %s7081_s0, %s4691_s29  ;;  %s4309_s12 = sshll.u32 %s7099_s22, 5  ;;  %355 = vst.msk [vmem:[#allocation2 + $0x1e8] sm:$0xff] (!%p4311_p7), %vm293_vm0, %v5654_v3  ;;  %294 = vst.msk [vmem:[#allocation2] sm:$0xff] (!%p4311_p7), %vm293_vm0, %v5654_v3 }
  0x13   : > { %s285_s13 = sadd.s32 %s4309_s12, %s7101_s28  ;;  %292 = sbr.rel (%p4311_p7) target bundleno = 135 (0x87), region = 48  ;;  %v5743_v0 = vld [vmem:[%s5733_s11] sm:$0xff] (!%p4311_p7)  ;;  %v5746_v1 = vld [vmem:[%s5733_s11 + $0x8] sm:$0xff] (!%p4311_p7)  ;;  %v5749_v2 = vld [vmem:[%s5733_s11 + $0x10] sm:$0xff] (!%p4311_p7)  ;;  %295 = vst.msk [vmem:[#allocation2 + $0x8] sm:$0xff] (!%p4311_p7), %vm293_vm0, %v5654_v3 }
  0x14   : > { %s4310_s14 = sshll.u32 %s285_s13, 3  ;;  %296 = vst.msk [vmem:[#allocation2 + $0x10] sm:$0xff] (!%p4311_p7), %vm293_vm0, %v5654_v3  ;;  %297 = vst.msk [vmem:[#allocation2 + $0x18] sm:$0xff] (!%p4311_p7), %vm293_vm0, %v5654_v3  ;;  %v497_v4 = vld [vmem:[%s5733_s11 + $0x18] sm:$0xff] (!%p4311_p7)  ;;  %v498_v5 = vld [vmem:[%s5733_s11 + $0x20] sm:$0xff] (!%p4311_p7) }
  0x15   : > { %s5739_s17 = scalar_lea.vmem %s7087_s6, %s4310_s14  ;;  %298 = vst.msk [vmem:[#allocation2 + $0x20] sm:$0xff] (!%p4311_p7), %vm293_vm0, %v5654_v3  ;;  %299 = vst.msk [vmem:[#allocation2 + $0x28] sm:$0xff] (!%p4311_p7), %vm293_vm0, %v5654_v3  ;;  %v499_v6 = vld [vmem:[%s5733_s11 + $0x28] sm:$0xff] (!%p4311_p7)  ;;  %v500_v7 = vld [vmem:[%s5733_s11 + $0x30] sm:$0xff] (!%p4311_p7) }
  0x16   : > { %300 = vst.msk [vmem:[#allocation2 + $0x30] sm:$0xff] (!%p4311_p7), %vm293_vm0, %v5654_v3  ;;  %301 = vst.msk [vmem:[#allocation2 + $0x38] sm:$0xff] (!%p4311_p7), %vm293_vm0, %v5654_v3  ;;  %v501_v8 = vld [vmem:[%s5733_s11 + $0x38] sm:$0xff] (!%p4311_p7)  ;;  %v502_v9 = vld [vmem:[%s5733_s11 + $0x40] sm:$0xff] (!%p4311_p7) }
  0x17   : > { %302 = vst.msk [vmem:[#allocation2 + $0x40] sm:$0xff] (!%p4311_p7), %vm293_vm0, %v5654_v3  ;;  %303 = vst.msk [vmem:[#allocation2 + $0x48] sm:$0xff] (!%p4311_p7), %vm293_vm0, %v5654_v3  ;;  %v503_v10 = vld [vmem:[%s5733_s11 + $0x48] sm:$0xff] (!%p4311_p7)  ;;  %v504_v11 = vld [vmem:[%s5733_s11 + $0x50] sm:$0xff] (!%p4311_p7) }
  0x18   : > { %304 = vst.msk [vmem:[#allocation2 + $0x50] sm:$0xff] (!%p4311_p7), %vm293_vm0, %v5654_v3  ;;  %305 = vst.msk [vmem:[#allocation2 + $0x58] sm:$0xff] (!%p4311_p7), %vm293_vm0, %v5654_v3  ;;  %v505_v12 = vld [vmem:[%s5733_s11 + $0x58] sm:$0xff] (!%p4311_p7)  ;;  %v506_v13 = vld [vmem:[%s5733_s11 + $0x60] sm:$0xff] (!%p4311_p7) }
  0x19   : > { %306 = vst.msk [vmem:[#allocation2 + $0x60] sm:$0xff] (!%p4311_p7), %vm293_vm0, %v5654_v3  ;;  %307 = vst.msk [vmem:[#allocation2 + $0x68] sm:$0xff] (!%p4311_p7), %vm293_vm0, %v5654_v3  ;;  %v507_v14 = vld [vmem:[%s5733_s11 + $0x68] sm:$0xff] (!%p4311_p7)  ;;  %v508_v15 = vld [vmem:[%s5733_s11 + $0x70] sm:$0xff] (!%p4311_p7) }
  0x1a   : > { %308 = vst.msk [vmem:[#allocation2 + $0x70] sm:$0xff] %vm293_vm0, %v5654_v3  ;;  %309 = vst.msk [vmem:[#allocation2 + $0x78] sm:$0xff] %vm293_vm0, %v5654_v3  ;;  %v509_v16 = vld [vmem:[%s5733_s11 + $0x78] sm:$0xff]  ;;  %v510_v17 = vld [vmem:[%s5733_s11 + $0x80] sm:$0xff] }
  0x1b   : > { %310 = vst.msk [vmem:[#allocation2 + $0x80] sm:$0xff] %vm293_vm0, %v5654_v3  ;;  %311 = vst.msk [vmem:[#allocation2 + $0x88] sm:$0xff] %vm293_vm0, %v5654_v3  ;;  %v511_v18 = vld [vmem:[%s5733_s11 + $0x88] sm:$0xff]  ;;  %v512_v19 = vld [vmem:[%s5733_s11 + $0x90] sm:$0xff] }
  0x1c   : > { %312 = vst.msk [vmem:[#allocation2 + $0x90] sm:$0xff] %vm293_vm0, %v5654_v3  ;;  %313 = vst.msk [vmem:[#allocation2 + $0x98] sm:$0xff] %vm293_vm0, %v5654_v3  ;;  %v513_v20 = vld [vmem:[%s5733_s11 + $0x98] sm:$0xff]  ;;  %v514_v21 = vld [vmem:[%s5733_s11 + $0xa0] sm:$0xff] }
  0x1d   : > { %314 = vst.msk [vmem:[#allocation2 + $0xa0] sm:$0xff] %vm293_vm0, %v5654_v3  ;;  %315 = vst.msk [vmem:[#allocation2 + $0xa8] sm:$0xff] %vm293_vm0, %v5654_v3  ;;  %v515_v22 = vld [vmem:[%s5733_s11 + $0xa8] sm:$0xff]  ;;  %v516_v23 = vld [vmem:[%s5733_s11 + $0xb0] sm:$0xff] }
  0x1e   : > { %316 = vst.msk [vmem:[#allocation2 + $0xb0] sm:$0xff] %vm293_vm0, %v5654_v3  ;;  %317 = vst.msk [vmem:[#allocation2 + $0xb8] sm:$0xff] %vm293_vm0, %v5654_v3  ;;  %v517_v24 = vld [vmem:[%s5733_s11 + $0xb8] sm:$0xff]  ;;  %v518_v25 = vld [vmem:[%s5733_s11 + $0xc0] sm:$0xff] }
  0x1f   : > { %318 = vst.msk [vmem:[#allocation2 + $0xc0] sm:$0xff] %vm293_vm0, %v5654_v3  ;;  %319 = vst.msk [vmem:[#allocation2 + $0xc8] sm:$0xff] %vm293_vm0, %v5654_v3  ;;  %v519_v26 = vld [vmem:[%s5733_s11 + $0xc8] sm:$0xff]  ;;  %v520_v27 = vld [vmem:[%s5733_s11 + $0xd0] sm:$0xff] }
  0x20   : > { %320 = vst.msk [vmem:[#allocation2 + $0xd0] sm:$0xff] %vm293_vm0, %v5654_v3  ;;  %321 = vst.msk [vmem:[#allocation2 + $0xd8] sm:$0xff] %vm293_vm0, %v5654_v3  ;;  %v521_v28 = vld [vmem:[%s5733_s11 + $0xd8] sm:$0xff]  ;;  %v522_v29 = vld [vmem:[%s5733_s11 + $0xe0] sm:$0xff] }
  0x21   : > { %322 = vst.msk [vmem:[#allocation2 + $0xe0] sm:$0xff] %vm293_vm0, %v5654_v3  ;;  %323 = vst.msk [vmem:[#allocation2 + $0xe8] sm:$0xff] %vm293_vm0, %v5654_v3  ;;  %v523_v30 = vld [vmem:[%s5733_s11 + $0xe8] sm:$0xff]  ;;  %v524_v31 = vld [vmem:[%s5733_s11 + $0xf0] sm:$0xff] }
  0x22   : > { %324 = vst.msk [vmem:[#allocation2 + $0xf0] sm:$0xff] %vm293_vm0, %v5654_v3  ;;  %325 = vst.msk [vmem:[#allocation2 + $0xf8] sm:$0xff] %vm293_vm0, %v5654_v3  ;;  %v525_v32 = vld [vmem:[%s5733_s11 + $0xf8] sm:$0xff] }
  0x23   : > { %326 = vst.msk [vmem:[#allocation2 + $0x100] sm:$0xff] %vm293_vm0, %v5654_v3  ;;  %327 = vst.msk [vmem:[#allocation2 + $0x108] sm:$0xff] %vm293_vm0, %v5654_v3 }
  0x24   : > { %328 = vst.msk [vmem:[#allocation2 + $0x110] sm:$0xff] %vm293_vm0, %v5654_v3  ;;  %329 = vst.msk [vmem:[#allocation2 + $0x118] sm:$0xff] %vm293_vm0, %v5654_v3 }
  0x25   : > { %330 = vst.msk [vmem:[#allocation2 + $0x120] sm:$0xff] %vm293_vm0, %v5654_v3  ;;  %331 = vst.msk [vmem:[#allocation2 + $0x128] sm:$0xff] %vm293_vm0, %v5654_v3 }
  0x26   : > { %332 = vst.msk [vmem:[#allocation2 + $0x130] sm:$0xff] %vm293_vm0, %v5654_v3  ;;  %333 = vst.msk [vmem:[#allocation2 + $0x138] sm:$0xff] %vm293_vm0, %v5654_v3 }
  0x27   : > { %334 = vst.msk [vmem:[#allocation2 + $0x140] sm:$0xff] %vm293_vm0, %v5654_v3  ;;  %335 = vst.msk [vmem:[#allocation2 + $0x148] sm:$0xff] %vm293_vm0, %v5654_v3 }
  0x28   : > { %336 = vst.msk [vmem:[#allocation2 + $0x150] sm:$0xff] %vm293_vm0, %v5654_v3  ;;  %337 = vst.msk [vmem:[#allocation2 + $0x158] sm:$0xff] %vm293_vm0, %v5654_v3 }
  0x29   : > { %338 = vst.msk [vmem:[#allocation2 + $0x160] sm:$0xff] %vm293_vm0, %v5654_v3  ;;  %339 = vst.msk [vmem:[#allocation2 + $0x168] sm:$0xff] %vm293_vm0, %v5654_v3 }
  0x2a   : > { %340 = vst.msk [vmem:[#allocation2 + $0x170] sm:$0xff] %vm293_vm0, %v5654_v3  ;;  %341 = vst.msk [vmem:[#allocation2 + $0x178] sm:$0xff] %vm293_vm0, %v5654_v3 }
  0x2b   : > { %342 = vst.msk [vmem:[#allocation2 + $0x180] sm:$0xff] %vm293_vm0, %v5654_v3  ;;  %343 = vst.msk [vmem:[#allocation2 + $0x188] sm:$0xff] %vm293_vm0, %v5654_v3 }
  0x2c   : > { %344 = vst.msk [vmem:[#allocation2 + $0x190] sm:$0xff] %vm293_vm0, %v5654_v3  ;;  %345 = vst.msk [vmem:[#allocation2 + $0x198] sm:$0xff] %vm293_vm0, %v5654_v3 }
  0x2d   : > { %346 = vst.msk [vmem:[#allocation2 + $0x1a0] sm:$0xff] %vm293_vm0, %v5654_v3  ;;  %347 = vst.msk [vmem:[#allocation2 + $0x1a8] sm:$0xff] %vm293_vm0, %v5654_v3 }
  0x2e   : > { %348 = vst.msk [vmem:[#allocation2 + $0x1b0] sm:$0xff] %vm293_vm0, %v5654_v3  ;;  %349 = vst.msk [vmem:[#allocation2 + $0x1b8] sm:$0xff] %vm293_vm0, %v5654_v3 }
  0x2f   : > { %350 = vst.msk [vmem:[#allocation2 + $0x1c0] sm:$0xff] %vm293_vm0, %v5654_v3  ;;  %351 = vst.msk [vmem:[#allocation2 + $0x1c8] sm:$0xff] %vm293_vm0, %v5654_v3 }
  0x30   : > { %352 = vst.msk [vmem:[#allocation2 + $0x1d0] sm:$0xff] %vm293_vm0, %v5654_v3  ;;  %353 = vst.msk [vmem:[#allocation2 + $0x1d8] sm:$0xff] %vm293_vm0, %v5654_v3 }
  0x31   : > { %354 = vst.msk [vmem:[#allocation2 + $0x1e0] sm:$0xff] %vm293_vm0, %v5654_v3  ;;  %356 = vst.msk [vmem:[#allocation2 + $0x1f0] sm:$0xff] %vm293_vm0, %v5654_v3 }
  0x32   : > { %357 = vst.msk [vmem:[#allocation2 + $0x1f8] sm:$0xff] %vm293_vm0, %v5654_v3  ;;  %358 = vst.msk [vmem:[#allocation2 + $0x200] sm:$0xff] %vm293_vm0, %v5654_v3 }
  0x33   : > { %359 = vst.msk [vmem:[#allocation2 + $0x208] sm:$0xff] %vm293_vm0, %v5654_v3  ;;  %360 = vst.msk [vmem:[#allocation2 + $0x210] sm:$0xff] %vm293_vm0, %v5654_v3 }
  0x34   : > { %361 = vst.msk [vmem:[#allocation2 + $0x218] sm:$0xff] %vm293_vm0, %v5654_v3  ;;  %362 = vst.msk [vmem:[#allocation2 + $0x220] sm:$0xff] %vm293_vm0, %v5654_v3 }
  0x35   : > { %363 = vst.msk [vmem:[#allocation2 + $0x228] sm:$0xff] %vm293_vm0, %v5654_v3  ;;  %364 = vst.msk [vmem:[#allocation2 + $0x230] sm:$0xff] %vm293_vm0, %v5654_v3 }
  0x36   : > { %365 = vst.msk [vmem:[#allocation2 + $0x238] sm:$0xff] %vm293_vm0, %v5654_v3  ;;  %366 = vst.msk [vmem:[#allocation2 + $0x240] sm:$0xff] %vm293_vm0, %v5654_v3 }
  0x37   : > { %367 = vst.msk [vmem:[#allocation2 + $0x248] sm:$0xff] %vm293_vm0, %v5654_v3  ;;  %368 = vst.msk [vmem:[#allocation2 + $0x250] sm:$0xff] %vm293_vm0, %v5654_v3 }
  0x38   : > { %369 = vst.msk [vmem:[#allocation2 + $0x258] sm:$0xff] %vm293_vm0, %v5654_v3  ;;  %370 = vst.msk [vmem:[#allocation2 + $0x260] sm:$0xff] %vm293_vm0, %v5654_v3 }
  0x39   : > { %371 = vst.msk [vmem:[#allocation2 + $0x268] sm:$0xff] %vm293_vm0, %v5654_v3  ;;  %372 = vst.msk [vmem:[#allocation2 + $0x270] sm:$0xff] %vm293_vm0, %v5654_v3 }
  0x3a   : > { %373 = vst.msk [vmem:[#allocation2 + $0x278] sm:$0xff] %vm293_vm0, %v5654_v3  ;;  %374 = vst.msk [vmem:[#allocation2 + $0x280] sm:$0xff] %vm293_vm0, %v5654_v3 }
  0x3b   : > { %375 = vst.msk [vmem:[#allocation2 + $0x288] sm:$0xff] %vm293_vm0, %v5654_v3  ;;  %376 = vst.msk [vmem:[#allocation2 + $0x290] sm:$0xff] %vm293_vm0, %v5654_v3 }
  0x3c   : > { %377 = vst.msk [vmem:[#allocation2 + $0x298] sm:$0xff] %vm293_vm0, %v5654_v3  ;;  %378 = vst.msk [vmem:[#allocation2 + $0x2a0] sm:$0xff] %vm293_vm0, %v5654_v3 }
  0x3d   : > { %379 = vst.msk [vmem:[#allocation2 + $0x2a8] sm:$0xff] %vm293_vm0, %v5654_v3  ;;  %380 = vst.msk [vmem:[#allocation2 + $0x2b0] sm:$0xff] %vm293_vm0, %v5654_v3 }
  0x3e   : > { %381 = vst.msk [vmem:[#allocation2 + $0x2b8] sm:$0xff] %vm293_vm0, %v5654_v3  ;;  %382 = vst.msk [vmem:[#allocation2 + $0x2c0] sm:$0xff] %vm293_vm0, %v5654_v3 }
  0x3f   : > { %383 = vst.msk [vmem:[#allocation2 + $0x2c8] sm:$0xff] %vm293_vm0, %v5654_v3  ;;  %384 = vst.msk [vmem:[#allocation2 + $0x2d0] sm:$0xff] %vm293_vm0, %v5654_v3 }
  0x40   : > { %385 = vst.msk [vmem:[#allocation2 + $0x2d8] sm:$0xff] %vm293_vm0, %v5654_v3  ;;  %386 = vst.msk [vmem:[#allocation2 + $0x2e0] sm:$0xff] %vm293_vm0, %v5654_v3 }
  0x41   : > { %387 = vst.msk [vmem:[#allocation2 + $0x2e8] sm:$0xff] %vm293_vm0, %v5654_v3  ;;  %388 = vst.msk [vmem:[#allocation2 + $0x2f0] sm:$0xff] %vm293_vm0, %v5654_v3 }
  0x42   : > { %389 = vst.msk [vmem:[#allocation2 + $0x2f8] sm:$0xff] %vm293_vm0, %v5654_v3  ;;  %390 = vst.msk [vmem:[#allocation2 + $0x300] sm:$0xff] %vm293_vm0, %v5654_v3 }
  0x43   : > { %391 = vst.msk [vmem:[#allocation2 + $0x308] sm:$0xff] %vm293_vm0, %v5654_v3  ;;  %392 = vst.msk [vmem:[#allocation2 + $0x310] sm:$0xff] %vm293_vm0, %v5654_v3 }
  0x44   : > { %393 = vst.msk [vmem:[#allocation2 + $0x318] sm:$0xff] %vm293_vm0, %v5654_v3  ;;  %394 = vst.msk [vmem:[#allocation2 + $0x320] sm:$0xff] %vm293_vm0, %v5654_v3 }
  0x45   : > { %395 = vst.msk [vmem:[#allocation2 + $0x328] sm:$0xff] %vm293_vm0, %v5654_v3  ;;  %396 = vst.msk [vmem:[#allocation2 + $0x330] sm:$0xff] %vm293_vm0, %v5654_v3 }
  0x46   : > { %397 = vst.msk [vmem:[#allocation2 + $0x338] sm:$0xff] %vm293_vm0, %v5654_v3  ;;  %398 = vst.msk [vmem:[#allocation2 + $0x340] sm:$0xff] %vm293_vm0, %v5654_v3 }
  0x47   : > { %399 = vst.msk [vmem:[#allocation2 + $0x348] sm:$0xff] %vm293_vm0, %v5654_v3  ;;  %400 = vst.msk [vmem:[#allocation2 + $0x350] sm:$0xff] %vm293_vm0, %v5654_v3 }
  0x48   : > { %401 = vst.msk [vmem:[#allocation2 + $0x358] sm:$0xff] %vm293_vm0, %v5654_v3  ;;  %402 = vst.msk [vmem:[#allocation2 + $0x360] sm:$0xff] %vm293_vm0, %v5654_v3 }
  0x49   : > { %403 = vst.msk [vmem:[#allocation2 + $0x368] sm:$0xff] %vm293_vm0, %v5654_v3  ;;  %404 = vst.msk [vmem:[#allocation2 + $0x370] sm:$0xff] %vm293_vm0, %v5654_v3 }
  0x4a   : > { %405 = vst.msk [vmem:[#allocation2 + $0x378] sm:$0xff] %vm293_vm0, %v5654_v3  ;;  %406 = vst.msk [vmem:[#allocation2 + $0x380] sm:$0xff] %vm293_vm0, %v5654_v3 }
  0x4b   : > { %407 = vst.msk [vmem:[#allocation2 + $0x388] sm:$0xff] %vm293_vm0, %v5654_v3  ;;  %408 = vst.msk [vmem:[#allocation2 + $0x390] sm:$0xff] %vm293_vm0, %v5654_v3 }
  0x4c   : > { %409 = vst.msk [vmem:[#allocation2 + $0x398] sm:$0xff] %vm293_vm0, %v5654_v3  ;;  %410 = vst.msk [vmem:[#allocation2 + $0x3a0] sm:$0xff] %vm293_vm0, %v5654_v3 }
  0x4d   : > { %411 = vst.msk [vmem:[#allocation2 + $0x3a8] sm:$0xff] %vm293_vm0, %v5654_v3  ;;  %412 = vst.msk [vmem:[#allocation2 + $0x3b0] sm:$0xff] %vm293_vm0, %v5654_v3 }
  0x4e   : > { %413 = vst.msk [vmem:[#allocation2 + $0x3b8] sm:$0xff] %vm293_vm0, %v5654_v3  ;;  %414 = vst.msk [vmem:[#allocation2 + $0x3c0] sm:$0xff] %vm293_vm0, %v5654_v3 }
  0x4f   : > { %415 = vst.msk [vmem:[#allocation2 + $0x3c8] sm:$0xff] %vm293_vm0, %v5654_v3  ;;  %416 = vst.msk [vmem:[#allocation2 + $0x3d0] sm:$0xff] %vm293_vm0, %v5654_v3 }
  0x50   : > { %417 = vst.msk [vmem:[#allocation2 + $0x3d8] sm:$0xff] %vm293_vm0, %v5654_v3  ;;  %418 = vst.msk [vmem:[#allocation2 + $0x3e0] sm:$0xff] %vm293_vm0, %v5654_v3 }
  0x51   : > { %419 = vst.msk [vmem:[#allocation2 + $0x3e8] sm:$0xff] %vm293_vm0, %v5654_v3  ;;  %420 = vst.msk [vmem:[#allocation2 + $0x3f0] sm:$0xff] %vm293_vm0, %v5654_v3 }
  0x52   : > { %421 = vst.msk [vmem:[#allocation2 + $0x3f8] sm:$0xff] %vm293_vm0, %v5654_v3  ;;  %422 = vst.msk [vmem:[#allocation2 + $0x400] sm:$0xff] %vm293_vm0, %v5654_v3 }
  0x53   : > { %423 = vst.msk [vmem:[#allocation2 + $0x408] sm:$0xff] %vm293_vm0, %v5654_v3  ;;  %424 = vst.msk [vmem:[#allocation2 + $0x410] sm:$0xff] %vm293_vm0, %v5654_v3 }
  0x54   : > { %425 = vst.msk [vmem:[#allocation2 + $0x418] sm:$0xff] %vm293_vm0, %v5654_v3  ;;  %426 = vst.msk [vmem:[#allocation2 + $0x420] sm:$0xff] %vm293_vm0, %v5654_v3 }
  0x55   : > { %427 = vst.msk [vmem:[#allocation2 + $0x428] sm:$0xff] %vm293_vm0, %v5654_v3  ;;  %428 = vst.msk [vmem:[#allocation2 + $0x430] sm:$0xff] %vm293_vm0, %v5654_v3 }
  0x56   : > { %429 = vst.msk [vmem:[#allocation2 + $0x438] sm:$0xff] %vm293_vm0, %v5654_v3  ;;  %430 = vst.msk [vmem:[#allocation2 + $0x440] sm:$0xff] %vm293_vm0, %v5654_v3 }
  0x57   : > { %431 = vst.msk [vmem:[#allocation2 + $0x448] sm:$0xff] %vm293_vm0, %v5654_v3  ;;  %432 = vst.msk [vmem:[#allocation2 + $0x450] sm:$0xff] %vm293_vm0, %v5654_v3 }
  0x58   : > { %433 = vst.msk [vmem:[#allocation2 + $0x458] sm:$0xff] %vm293_vm0, %v5654_v3  ;;  %434 = vst.msk [vmem:[#allocation2 + $0x460] sm:$0xff] %vm293_vm0, %v5654_v3 }
  0x59   : > { %435 = vst.msk [vmem:[#allocation2 + $0x468] sm:$0xff] %vm293_vm0, %v5654_v3  ;;  %436 = vst.msk [vmem:[#allocation2 + $0x470] sm:$0xff] %vm293_vm0, %v5654_v3 }
  0x5a   : > { %437 = vst.msk [vmem:[#allocation2 + $0x478] sm:$0xff] %vm293_vm0, %v5654_v3  ;;  %438 = vst.msk [vmem:[#allocation2 + $0x480] sm:$0xff] %vm293_vm0, %v5654_v3 }
  0x5b   : > { %439 = vst.msk [vmem:[#allocation2 + $0x488] sm:$0xff] %vm293_vm0, %v5654_v3  ;;  %440 = vst.msk [vmem:[#allocation2 + $0x490] sm:$0xff] %vm293_vm0, %v5654_v3 }
  0x5c   : > { %441 = vst.msk [vmem:[#allocation2 + $0x498] sm:$0xff] %vm293_vm0, %v5654_v3  ;;  %442 = vst.msk [vmem:[#allocation2 + $0x4a0] sm:$0xff] %vm293_vm0, %v5654_v3 }
  0x5d   : > { %443 = vst.msk [vmem:[#allocation2 + $0x4a8] sm:$0xff] %vm293_vm0, %v5654_v3  ;;  %444 = vst.msk [vmem:[#allocation2 + $0x4b0] sm:$0xff] %vm293_vm0, %v5654_v3 }
  0x5e   : > { %445 = vst.msk [vmem:[#allocation2 + $0x4b8] sm:$0xff] %vm293_vm0, %v5654_v3  ;;  %446 = vst.msk [vmem:[#allocation2 + $0x4c0] sm:$0xff] %vm293_vm0, %v5654_v3 }
  0x5f   : > { %447 = vst.msk [vmem:[#allocation2 + $0x4c8] sm:$0xff] %vm293_vm0, %v5654_v3  ;;  %448 = vst.msk [vmem:[#allocation2 + $0x4d0] sm:$0xff] %vm293_vm0, %v5654_v3 }
  0x60   : > { %449 = vst.msk [vmem:[#allocation2 + $0x4d8] sm:$0xff] %vm293_vm0, %v5654_v3  ;;  %450 = vst.msk [vmem:[#allocation2 + $0x4e0] sm:$0xff] %vm293_vm0, %v5654_v3 }
  0x61   : > { %451 = vst.msk [vmem:[#allocation2 + $0x4e8] sm:$0xff] %vm293_vm0, %v5654_v3  ;;  %452 = vst.msk [vmem:[#allocation2 + $0x4f0] sm:$0xff] %vm293_vm0, %v5654_v3 }
  0x62   : > { %453 = vst.msk [vmem:[#allocation2 + $0x4f8] sm:$0xff] %vm293_vm0, %v5654_v3  ;;  %454 = vst.msk [vmem:[#allocation2 + $0x500] sm:$0xff] %vm293_vm0, %v5654_v3 }
  0x63   : > { %455 = vst.msk [vmem:[#allocation2 + $0x508] sm:$0xff] %vm293_vm0, %v5654_v3  ;;  %456 = vst.msk [vmem:[#allocation2 + $0x510] sm:$0xff] %vm293_vm0, %v5654_v3 }
  0x64   : > { %457 = vst.msk [vmem:[#allocation2 + $0x518] sm:$0xff] %vm293_vm0, %v5654_v3  ;;  %458 = vst.msk [vmem:[#allocation2 + $0x520] sm:$0xff] %vm293_vm0, %v5654_v3 }
  0x65   : > { %459 = vst.msk [vmem:[#allocation2 + $0x528] sm:$0xff] %vm293_vm0, %v5654_v3  ;;  %460 = vst.msk [vmem:[#allocation2 + $0x530] sm:$0xff] %vm293_vm0, %v5654_v3 }
  0x66   : > { %461 = vst.msk [vmem:[#allocation2 + $0x538] sm:$0xff] %vm293_vm0, %v5654_v3  ;;  %462 = vst.msk [vmem:[#allocation2 + $0x540] sm:$0xff] %vm293_vm0, %v5654_v3 }
  0x67   : > { %463 = vst.msk [vmem:[#allocation2 + $0x548] sm:$0xff] %vm293_vm0, %v5654_v3  ;;  %464 = vst.msk [vmem:[#allocation2 + $0x550] sm:$0xff] %vm293_vm0, %v5654_v3 }
  0x68   : > { %465 = vst.msk [vmem:[#allocation2 + $0x558] sm:$0xff] %vm293_vm0, %v5654_v3  ;;  %466 = vst.msk [vmem:[#allocation2 + $0x560] sm:$0xff] %vm293_vm0, %v5654_v3 }
  0x69   : > { %467 = vst.msk [vmem:[#allocation2 + $0x568] sm:$0xff] %vm293_vm0, %v5654_v3  ;;  %468 = vst.msk [vmem:[#allocation2 + $0x570] sm:$0xff] %vm293_vm0, %v5654_v3 }
  0x6a   : > { %469 = vst.msk [vmem:[#allocation2 + $0x578] sm:$0xff] %vm293_vm0, %v5654_v3  ;;  %470 = vst.msk [vmem:[#allocation2 + $0x580] sm:$0xff] %vm293_vm0, %v5654_v3 }
  0x6b   : > { %471 = vst.msk [vmem:[#allocation2 + $0x588] sm:$0xff] %vm293_vm0, %v5654_v3  ;;  %472 = vst.msk [vmem:[#allocation2 + $0x590] sm:$0xff] %vm293_vm0, %v5654_v3 }
  0x6c   : > { %473 = vst.msk [vmem:[#allocation2 + $0x598] sm:$0xff] %vm293_vm0, %v5654_v3  ;;  %474 = vst.msk [vmem:[#allocation2 + $0x5a0] sm:$0xff] %vm293_vm0, %v5654_v3 }
  0x6d   : > { %475 = vst.msk [vmem:[#allocation2 + $0x5a8] sm:$0xff] %vm293_vm0, %v5654_v3  ;;  %476 = vst.msk [vmem:[#allocation2 + $0x5b0] sm:$0xff] %vm293_vm0, %v5654_v3 }
  0x6e   : > { %477 = vst.msk [vmem:[#allocation2 + $0x5b8] sm:$0xff] %vm293_vm0, %v5654_v3  ;;  %478 = vst.msk [vmem:[#allocation2 + $0x5c0] sm:$0xff] %vm293_vm0, %v5654_v3 }
  0x6f   : > { %479 = vst.msk [vmem:[#allocation2 + $0x5c8] sm:$0xff] %vm293_vm0, %v5654_v3  ;;  %480 = vst.msk [vmem:[#allocation2 + $0x5d0] sm:$0xff] %vm293_vm0, %v5654_v3 }
  0x70   : > { %481 = vst.msk [vmem:[#allocation2 + $0x5d8] sm:$0xff] %vm293_vm0, %v5654_v3  ;;  %482 = vst.msk [vmem:[#allocation2 + $0x5e0] sm:$0xff] %vm293_vm0, %v5654_v3 }
  0x71   : > { %483 = vst.msk [vmem:[#allocation2 + $0x5e8] sm:$0xff] %vm293_vm0, %v5654_v3  ;;  %484 = vst.msk [vmem:[#allocation2 + $0x5f0] sm:$0xff] %vm293_vm0, %v5654_v3 }
  0x72   : > { %485 = vst.msk [vmem:[#allocation2 + $0x5f8] sm:$0xff] %vm293_vm0, %v5654_v3  ;;  %486 = vst.msk [vmem:[#allocation2 + $0x600] sm:$0xff] %vm293_vm0, %v5654_v3 }
  0x73   : > { %487 = vst.msk [vmem:[#allocation2 + $0x608] sm:$0xff] %vm293_vm0, %v5654_v3  ;;  %488 = vst.msk [vmem:[#allocation2 + $0x610] sm:$0xff] %vm293_vm0, %v5654_v3 }
  0x74   : > { %489 = vst.msk [vmem:[#allocation2 + $0x618] sm:$0xff] %vm293_vm0, %v5654_v3  ;;  %490 = vst.msk [vmem:[#allocation2 + $0x620] sm:$0xff] %vm293_vm0, %v5654_v3 }
  0x75   : > { %491 = vst.msk [vmem:[#allocation2 + $0x628] sm:$0xff] %vm293_vm0, %v5654_v3  ;;  %492 = vst.msk [vmem:[#allocation2 + $0x630] sm:$0xff] %vm293_vm0, %v5654_v3 }
  0x76   : > { %493 = vst.msk [vmem:[#allocation2 + $0x638] sm:$0xff] %vm293_vm0, %v5654_v3  ;;  %527 = vst.msk [vmem:[#allocation2 + $0x1ec] sm:$0xff] %vm293_vm0, %v5743_v0 }
  0x77   : > { %528 = vst.msk [vmem:[#allocation2 + $0x1f4] sm:$0xff] %vm293_vm0, %v5746_v1  ;;  %529 = vst.msk [vmem:[#allocation2 + $0x214] sm:$0xff] %vm293_vm0, %v5749_v2 }
  0x78   : > { %530 = vst.msk [vmem:[#allocation2 + $0x21c] sm:$0xff] %vm293_vm0, %v497_v4  ;;  %531 = vst.msk [vmem:[#allocation2 + $0x23c] sm:$0xff] %vm293_vm0, %v498_v5 }
  0x79   : > { %532 = vst.msk [vmem:[#allocation2 + $0x244] sm:$0xff] %vm293_vm0, %v499_v6  ;;  %533 = vst.msk [vmem:[#allocation2 + $0x264] sm:$0xff] %vm293_vm0, %v500_v7 }
  0x7a   : > { %534 = vst.msk [vmem:[#allocation2 + $0x26c] sm:$0xff] %vm293_vm0, %v501_v8  ;;  %535 = vst.msk [vmem:[#allocation2 + $0x28c] sm:$0xff] %vm293_vm0, %v502_v9 }
  0x7b   : > { %536 = vst.msk [vmem:[#allocation2 + $0x294] sm:$0xff] %vm293_vm0, %v503_v10  ;;  %537 = vst.msk [vmem:[#allocation2 + $0x2b4] sm:$0xff] %vm293_vm0, %v504_v11 }
  0x7c   : > { %538 = vst.msk [vmem:[#allocation2 + $0x2bc] sm:$0xff] %vm293_vm0, %v505_v12  ;;  %539 = vst.msk [vmem:[#allocation2 + $0x2dc] sm:$0xff] %vm293_vm0, %v506_v13 }
  0x7d   : > { %540 = vst.msk [vmem:[#allocation2 + $0x2e4] sm:$0xff] %vm293_vm0, %v507_v14  ;;  %541 = vst.msk [vmem:[#allocation2 + $0x304] sm:$0xff] %vm293_vm0, %v508_v15 }
  0x7e   : > { %542 = vst.msk [vmem:[#allocation2 + $0x30c] sm:$0xff] %vm293_vm0, %v509_v16  ;;  %543 = vst.msk [vmem:[#allocation2 + $0x32c] sm:$0xff] %vm293_vm0, %v510_v17 }
  0x7f   : > { %544 = vst.msk [vmem:[#allocation2 + $0x334] sm:$0xff] %vm293_vm0, %v511_v18  ;;  %545 = vst.msk [vmem:[#allocation2 + $0x354] sm:$0xff] %vm293_vm0, %v512_v19 }
  0x80   : > { %546 = vst.msk [vmem:[#allocation2 + $0x35c] sm:$0xff] %vm293_vm0, %v513_v20  ;;  %547 = vst.msk [vmem:[#allocation2 + $0x37c] sm:$0xff] %vm293_vm0, %v514_v21 }
  0x81   : > { %548 = vst.msk [vmem:[#allocation2 + $0x384] sm:$0xff] %vm293_vm0, %v515_v22  ;;  %549 = vst.msk [vmem:[#allocation2 + $0x3a4] sm:$0xff] %vm293_vm0, %v516_v23 }
  0x82   : > { %550 = vst.msk [vmem:[#allocation2 + $0x3ac] sm:$0xff] %vm293_vm0, %v517_v24  ;;  %551 = vst.msk [vmem:[#allocation2 + $0x3cc] sm:$0xff] %vm293_vm0, %v518_v25 }
  0x83   : > { %552 = vst.msk [vmem:[#allocation2 + $0x3d4] sm:$0xff] %vm293_vm0, %v519_v26  ;;  %553 = vst.msk [vmem:[#allocation2 + $0x3f4] sm:$0xff] %vm293_vm0, %v520_v27 }
  0x84   : > { %554 = vst.msk [vmem:[#allocation2 + $0x3fc] sm:$0xff] %vm293_vm0, %v521_v28  ;;  %555 = vst.msk [vmem:[#allocation2 + $0x41c] sm:$0xff] %vm293_vm0, %v522_v29 }
  0x85   : > { %556 = vst.msk [vmem:[#allocation2 + $0x424] sm:$0xff] %vm293_vm0, %v523_v30  ;;  %557 = vst.msk [vmem:[#allocation2 + $0x444] sm:$0xff] %vm293_vm0, %v524_v31 }
  0x86   : > { %558 = vst.msk [vmem:[#allocation2 + $0x44c] sm:$0xff] %vm293_vm0, %v525_v32 }
  0x87 PF: > { %vm633_vm1 = vcmask 1043456   ;;  %v4332_v33 = vld [vmem:[%s7083_s2 + $0x10] sm:$0xf]  ;;  %s4692_s20 = sshll.u32 %s5636_s21, 7  ;;  %vm584_vm2 = vcmask 31744   ;;  %s4333_s10 = smul.u32 320, %s5636_s21 }
  0x88   : > { %5017 = vmatprep.subr.msk.mxu1 %vm633_vm1, %v4332_v33  ;;  %s6221_s28 = scalar_lea.vmem %s5733_s11, %s4692_s20  ;;  %v4368_v34 = vld [vmem:[%s7083_s2 + $0x4] sm:$0xf]  ;;  %v4386_v38 = vld [vmem:[%s7083_s2 + $0x8] sm:$0xf]  ;;  %v4422_v55 = vld [vmem:[%s7083_s2 + $0xc] sm:$0xf] }
  0x89   : > { %5018 = vmatpush3.msk.msra.mxu1 %vm633_vm1, %v4332_v33  ;;  %v562_v35 = vld [vmem:[%s6221_s28] sm:$0xff]  ;;  %v6229_v36 = vld [vmem:[%s6221_s28 + $0x8] sm:$0xff]  ;;  %v6232_v37 = vld [vmem:[%s6221_s28 + $0x10] sm:$0xff]  ;;  %s6310_s11 = scalar_lea.vmem [#allocation2], %s4333_s10 }
  0x8a   : > { %5019 = vmatprep.mubr.msk.f32.mxu1 %vm584_vm2, %v562_v35  ;;  %5043 = vmatprep.subr.msk.mxu1 %vm633_vm1, %v4368_v34  ;;  %v6246_v39 = vld [vmem:[%s6221_s28 + $0x18] sm:$0xff]  ;;  %v6249_v40 = vld [vmem:[%s6221_s28 + $0x20] sm:$0xff]  ;;  %v6257_v41 = vld [vmem:[%s6221_s28 + $0x28] sm:$0xff] }
  0x8b   : > { %5020 = vmatmul.mubr.msk.f32.vlgmr.msra.gmra.mrb[0].mxu1 %vm584_vm2, %v6229_v36  ;;  %4967 = vmatprep.mubr.msk.f32.mxu0 %vm584_vm2, %v562_v35  ;;  %v6260_v42 = vld [vmem:[%s6221_s28 + $0x30] sm:$0xff]  ;;  %v6267_v43 = vld [vmem:[%s6221_s28 + $0x38] sm:$0xff]  ;;  %v6270_v44 = vld [vmem:[%s6221_s28 + $0x40] sm:$0xff] }
  0x8c   : > { %5044 = vmatpush3.msk.msra.mxu1 %vm633_vm1, %v4368_v34  ;;  %5022 = vmatprep.mubr.msk.f32.mxu1 %vm584_vm2, %v6232_v37  ;;  %v6277_v45 = vld [vmem:[%s6221_s28 + $0x48] sm:$0xff]  ;;  %v6280_v46 = vld [vmem:[%s6221_s28 + $0x50] sm:$0xff]  ;;  %v6287_v47 = vld [vmem:[%s6221_s28 + $0x58] sm:$0xff] }
  0x8d   : > { %5069 = vmatprep.subr.msk.mxu1 %vm633_vm1, %v4386_v38  ;;  %v6290_v48 = vld [vmem:[%s6221_s28 + $0x60] sm:$0xff]  ;;  %v6298_v49 = vld [vmem:[%s6221_s28 + $0x68] sm:$0xff]  ;;  %v6301_v50 = vld [vmem:[%s6221_s28 + $0x70] sm:$0xff] }
  0x8e   : > { %v6308_v51 = vld [vmem:[%s6221_s28 + $0x78] sm:$0xff]  ;;  %v1196_v52 = vld [vmem:[%s6310_s11 + $0xc] sm:$0xff]  ;;  %v1201_v58 = vld [vmem:[%s6310_s11 + $0x64] sm:$0xff] }
  0x8f   : > { %5023 = vmatmul.mubr.msk.f32.gmra.mrb[2].mxu1 %vm584_vm2, %v6246_v39  ;;  %v1197_v53 = vld [vmem:[%s6310_s11 + $0x14] sm:$0xff]  ;;  %v1199_v56 = vld [vmem:[%s6310_s11 + $0x3c] sm:$0xff]  ;;  %v1202_v59 = vld [vmem:[%s6310_s11 + $0x84] sm:$0xff] }
  0x90   : > { %5025 = vmatprep.mubr.msk.f32.mxu1 %vm584_vm2, %v6249_v40  ;;  %v1198_v54 = vld [vmem:[%s6310_s11 + $0x34] sm:$0xff]  ;;  %v1200_v57 = vld [vmem:[%s6310_s11 + $0x5c] sm:$0xff]  ;;  %v1203_v60 = vld [vmem:[%s6310_s11 + $0x8c] sm:$0xff] }
  0x91   : > { %v1204_v61 = vld [vmem:[%s6310_s11 + $0xac] sm:$0xff]  ;;  %v1205_v62 = vld [vmem:[%s6310_s11 + $0xb4] sm:$0xff]  ;;  %v1207_v0 = vld [vmem:[%s6310_s11 + $0xdc] sm:$0xff] }
  0x92   : > { %v1206_v63 = vld [vmem:[%s6310_s11 + $0xd4] sm:$0xff]  ;;  %v1208_v1 = vld [vmem:[%s6310_s11 + $0xfc] sm:$0xff]  ;;  %v1209_v2 = vld [vmem:[%s6310_s11 + $0x104] sm:$0xff] }
  0x93   : > { %5026 = vmatmul.mubr.msk.f32.gmra.mrb[4].mxu1 %vm584_vm2, %v6257_v41  ;;  %v1210_v3 = vld [vmem:[%s6310_s11 + $0x124] sm:$0xff]  ;;  %v578_v4 = vld [vmem:[%s7082_s1] sm:$0xf]  ;;  %v1211_v5 = vld [vmem:[%s6310_s11 + $0x12c] sm:$0xff] }
  0x94   : > { %5028 = vmatprep.mubr.msk.f32.mxu1 %vm584_vm2, %v6260_v42  ;;  %4965 = vmatprep.subr.msk.mxu0 %vm633_vm1, %v578_v4  ;;  %v1426_v6 = vld [vmem:[%s6310_s11 + $0x18] sm:$0xff]  ;;  %v851_v7 = vld [vmem:[%s7083_s2] sm:$0xf]  ;;  %v4456_v10 = vld [vmem:[%s7083_s2 + $0x14] sm:$0xf] }
  0x95   : > { %4966 = vmatpush3.msk.msra.mxu0 %vm633_vm1, %v578_v4  ;;  %v1427_v8 = vld [vmem:[%s6310_s11 + $0x20] sm:$0xff]  ;;  %v1429_v11 = vld [vmem:[%s6310_s11 + $0x48] sm:$0xff]  ;;  %v1431_v13 = vld [vmem:[%s6310_s11 + $0x70] sm:$0xff] }
  0x96   : > { %4968 = vmatmul.mubr.msk.f32.vlgmr.msra.gmra.mrb[0].mxu0 %vm584_vm2, %v6229_v36  ;;  %4991 = vmatprep.subr.msk.mxu0 %vm633_vm1, %v851_v7  ;;  %v1428_v9 = vld [vmem:[%s6310_s11 + $0x40] sm:$0xff]  ;;  %v1430_v12 = vld [vmem:[%s6310_s11 + $0x68] sm:$0xff]  ;;  %v1432_v14 = vld [vmem:[%s6310_s11 + $0x90] sm:$0xff] }
  0x97   : > { %5029 = vmatmul.mubr.msk.f32.gmra.mrb[6].mxu1 %vm584_vm2, %v6267_v43  ;;  %4970 = vmatprep.mubr.msk.f32.mxu0 %vm584_vm2, %v6232_v37  ;;  %v1433_v15 = vld [vmem:[%s6310_s11 + $0x98] sm:$0xff]  ;;  %v1435_v17 = vld [vmem:[%s6310_s11 + $0xc0] sm:$0xff]  ;;  %v1437_v19 = vld [vmem:[%s6310_s11 + $0xe8] sm:$0xff] }
  0x98   : > { %5031 = vmatprep.mubr.msk.f32.mxu1 %vm584_vm2, %v6270_v44  ;;  %4992 = vmatpush3.msk.msra.mxu0 %vm633_vm1, %v851_v7  ;;  %v1434_v16 = vld [vmem:[%s6310_s11 + $0xb8] sm:$0xff]  ;;  %v1436_v18 = vld [vmem:[%s6310_s11 + $0xe0] sm:$0xff]  ;;  %v1438_v20 = vld [vmem:[%s6310_s11 + $0x108] sm:$0xff] }
  0x99   : > { %v1439_v21 = vld [vmem:[%s6310_s11 + $0x110] sm:$0xff]  ;;  %v1441_v23 = vld [vmem:[%s6310_s11 + $0x138] sm:$0xff]  ;;  %v4406_v24 = vld [vmem:[%s6310_s11 + $0x1e0] sm:$0xff] }
  0x9a   : > { %4971 = vmatmul.mubr.msk.f32.gmra.mrb[2].mxu0 %vm584_vm2, %v6246_v39  ;;  %v1440_v22 = vld [vmem:[%s6310_s11 + $0x130] sm:$0xff]  ;;  %v835_v25 = vld [vmem:[%s6310_s11] sm:$0xff]  ;;  %v836_v26 = vld [vmem:[%s6310_s11 + $0x8] sm:$0xff] }
  0x9b   : > { %5032 = vmatmul.mubr.msk.f32.gmra.mrb[8].mxu1 %vm584_vm2, %v6277_v45  ;;  %4973 = vmatprep.mubr.msk.f32.mxu0 %vm584_vm2, %v6249_v40  ;;  %v4407_v27 = vld [vmem:[%s6310_s11 + $0x1e8] sm:$0xff]  ;;  %v6439_v29 = vld [vmem:[%s7083_s2 + $0x18] sm:$0xf]  ;;  %v838_v31 = vld [vmem:[%s6310_s11 + $0x30] sm:$0xff] }
  0x9c   : > { %5034 = vmatprep.mubr.msk.f32.mxu1 %vm584_vm2, %v6280_v46  ;;  %v4408_v28 = vld [vmem:[%s6310_s11 + $0x208] sm:$0xff]  ;;  %v4409_v32 = vld [vmem:[%s6310_s11 + $0x210] sm:$0xff]  ;;  %v840_v35 = vld [vmem:[%s6310_s11 + $0x58] sm:$0xff] }
  0x9d   : > { %v837_v30 = vld [vmem:[%s6310_s11 + $0x28] sm:$0xff]  ;;  %v4410_v33 = vld [vmem:[%s6310_s11 + $0x230] sm:$0xff]  ;;  %v4411_v36 = vld [vmem:[%s6310_s11 + $0x238] sm:$0xff] }
  0x9e   : > { %4974 = vmatmul.mubr.msk.f32.gmra.mrb[4].mxu0 %vm584_vm2, %v6257_v41  ;;  %v839_v34 = vld [vmem:[%s6310_s11 + $0x50] sm:$0xff]  ;;  %v4412_v37 = vld [vmem:[%s6310_s11 + $0x258] sm:$0xff]  ;;  %v842_v39 = vld [vmem:[%s6310_s11 + $0x80] sm:$0xff] }
  0x9f   : > { %5035 = vmatmul.mubr.msk.f32.gmra.mrb[10].mxu1 %vm584_vm2, %v6287_v47  ;;  %4976 = vmatprep.mubr.msk.f32.mxu0 %vm584_vm2, %v6260_v42  ;;  %v4413_v40 = vld [vmem:[%s6310_s11 + $0x260] sm:$0xff]  ;;  %v4453_v7 = vld [vmem:[%s6310_s11 + $0x2f0] sm:$0xff] }
  0xa0   : > { %5037 = vmatprep.mubr.msk.f32.mxu1 %vm584_vm2, %v6290_v48  ;;  %v4414_v41 = vld [vmem:[%s6310_s11 + $0x280] sm:$0xff] }
  0xa1   : > { %v843_v42 = vld [vmem:[%s6310_s11 + $0xa0] sm:$0xff] }
  0xa2   : > { %4977 = vmatmul.mubr.msk.f32.gmra.mrb[6].mxu0 %vm584_vm2, %v6267_v43  ;;  %v844_v43 = vld [vmem:[%s6310_s11 + $0xa8] sm:$0xff]  ;;  %v4450_v4 = vld [vmem:[%s6310_s11 + $0x2c0] sm:$0xff] }
  0xa3   : > { %5038 = vmatmul.mubr.msk.f32.gmra.mrb[12].mxu1 %vm584_vm2, %v6298_v49  ;;  %4979 = vmatprep.mubr.msk.f32.mxu0 %vm584_vm2, %v6270_v44  ;;  %v4415_v44 = vld [vmem:[%s6310_s11 + $0x288] sm:$0xff] }
  0xa4   : > { %5040 = vmatprep.mubr.msk.f32.mxu1 %vm584_vm2, %v6301_v50 }
  0xa6   : > { %4980 = vmatmul.mubr.msk.f32.gmra.mrb[8].mxu0 %vm584_vm2, %v6277_v45  ;;  %v4416_v45 = vld [vmem:[%s6310_s11 + $0x2a8] sm:$0xff] }
  0xa7   : > { %5041 = vmatmul.mubr.msk.f32.gmra.mrb[14].mxu1 %vm584_vm2, %v6308_v51  ;;  %4982 = vmatprep.mubr.msk.f32.mxu0 %vm584_vm2, %v6280_v46  ;;  %v845_v46 = vld [vmem:[%s6310_s11 + $0xc8] sm:$0xff] }
  0xa8   : > { %5045 = vmatprep.mubr.msk.f32.mxu1 %vm584_vm2, %v1196_v52  ;;  %v4419_v52 = vld [vmem:[%s6310_s11 + $0x2d8] sm:$0xff] }
  0xaa   : > { %4983 = vmatmul.mubr.msk.f32.gmra.mrb[10].mxu0 %vm584_vm2, %v6287_v47  ;;  %v846_v47 = vld [vmem:[%s6310_s11 + $0xd0] sm:$0xff] }
  0xab   : > { %5046 = vmatmul.mubr.msk.f32.vlgmr.msra.gmra.mrb[0].mxu1 %vm584_vm2, %v1197_v53  ;;  %4985 = vmatprep.mubr.msk.f32.mxu0 %vm584_vm2, %v6290_v48  ;;  %v4417_v48 = vld [vmem:[%s6310_s11 + $0x2b0] sm:$0xff]  ;;  %v4420_v53 = vld [vmem:[%s6310_s11 + $0x2f8] sm:$0xff] }
  0xac   : > { %5070 = vmatpush3.msk.msra.mxu1 %vm633_vm1, %v4386_v38  ;;  %5048 = vmatprep.mubr.msk.f32.mxu1 %vm584_vm2, %v1198_v54  ;;  %v841_v38 = vld [vmem:[%s6310_s11 + $0x78] sm:$0xff] }
  0xad   : > { %5095 = vmatprep.subr.msk.mxu1 %vm633_vm1, %v4422_v55  ;;  %v849_v54 = vld [vmem:[%s6310_s11 + $0x118] sm:$0xff] }
  0xae   : > { %4986 = vmatmul.mubr.msk.f32.gmra.mrb[12].mxu0 %vm584_vm2, %v6298_v49  ;;  %v4418_v49 = vld [vmem:[%s6310_s11 + $0x2d0] sm:$0xff] }
  0xaf   : > { %5049 = vmatmul.mubr.msk.f32.gmra.mrb[2].mxu1 %vm584_vm2, %v1199_v56  ;;  %4988 = vmatprep.mubr.msk.f32.mxu0 %vm584_vm2, %v6301_v50  ;;  %v847_v50 = vld [vmem:[%s6310_s11 + $0xf0] sm:$0xff]  ;;  %v4421_v56 = vld [vmem:[%s6310_s11 + $0x300] sm:$0xff] }
  0xb0   : > { %5051 = vmatprep.mubr.msk.f32.mxu1 %vm584_vm2, %v1200_v57  ;;  %v4440_v57 = vld [vmem:[%s6310_s11 + $0x1f8] sm:$0xff] }
  0xb2   : > { %4989 = vmatmul.mubr.msk.f32.gmra.mrb[14].mxu0 %vm584_vm2, %v6308_v51  ;;  %v848_v51 = vld [vmem:[%s6310_s11 + $0xf8] sm:$0xff] }
  0xb3   : > { %5052 = vmatmul.mubr.msk.f32.gmra.mrb[4].mxu1 %vm584_vm2, %v1201_v58  ;;  %4993 = vmatprep.mubr.msk.f32.mxu0 %vm584_vm2, %v835_v25  ;;  %v4441_v58 = vld [vmem:[%s6310_s11 + $0x200] sm:$0xff]  ;;  %v4489_v25 = vld [vmem:[%s6310_s11 + $0x4b8] sm:$0xff] }
  0xb4   : > { %5054 = vmatprep.mubr.msk.f32.mxu1 %vm584_vm2, %v1202_v59  ;;  %v4442_v59 = vld [vmem:[%s6310_s11 + $0x220] sm:$0xff] }
  0xb6   : > { %4994 = vmatmul.mubr.msk.f32.vlgmr.msra.gmra.mrb[16].mxu0 %vm584_vm2, %v836_v26  ;;  %v4490_v26 = vld [vmem:[%s6310_s11 + $0x4d8] sm:$0xff] }
  0xb7   : > { %5055 = vmatmul.mubr.msk.f32.gmra.mrb[6].mxu1 %vm584_vm2, %v1203_v60  ;;  %4996 = vmatprep.mubr.msk.f32.mxu0 %vm584_vm2, %v837_v30  ;;  %v4526_v60 = vld [vmem:[%s7083_s2 + $0x1c] sm:$0xf]  ;;  %v4512_v30 = vld [vmem:[%s6310_s11 + $0x3f4] sm:$0xff] }
  0xb8   : > { %5057 = vmatprep.mubr.msk.f32.mxu1 %vm584_vm2, %v1204_v61  ;;  %v4443_v61 = vld [vmem:[%s6310_s11 + $0x228] sm:$0xff] }
  0xba   : > { %4997 = vmatmul.mubr.msk.f32.gmra.mrb[18].mxu0 %vm584_vm2, %v838_v31  ;;  %v4513_v31 = vld [vmem:[%s6310_s11 + $0x3fc] sm:$0xff] }
  0xbb   : > { %5058 = vmatmul.mubr.msk.f32.gmra.mrb[8].mxu1 %vm584_vm2, %v1205_v62  ;;  %4999 = vmatprep.mubr.msk.f32.mxu0 %vm584_vm2, %v839_v34  ;;  %v4444_v62 = vld [vmem:[%s6310_s11 + $0x248] sm:$0xff] }
  0xbc   : > { %5060 = vmatprep.mubr.msk.f32.mxu1 %vm584_vm2, %v1206_v63  ;;  %v4445_v63 = vld [vmem:[%s6310_s11 + $0x250] sm:$0xff]  ;;  %v4516_v34 = vld [vmem:[%s6310_s11 + $0x444] sm:$0xff] }
  0xbe   : > { %5000 = vmatmul.mubr.msk.f32.gmra.mrb[20].mxu0 %vm584_vm2, %v840_v35  ;;  %v4517_v35 = vld [vmem:[%s6310_s11 + $0x44c] sm:$0xff] }
  0xbf   : > { %5061 = vmatmul.mubr.msk.f32.gmra.mrb[10].mxu1 %vm584_vm2, %v1207_v0  ;;  %5002 = vmatprep.mubr.msk.f32.mxu0 %vm584_vm2, %v841_v38  ;;  %v4446_v0 = vld [vmem:[%s6310_s11 + $0x270] sm:$0xff] }
  0xc0   : > { %5063 = vmatprep.mubr.msk.f32.mxu1 %vm584_vm2, %v1208_v1  ;;  %v4447_v1 = vld [vmem:[%s6310_s11 + $0x278] sm:$0xff] }
  0xc1   : > { %v4520_v38 = vld [vmem:[%s6310_s11 + $0x494] sm:$0xff] }
  0xc2   : > { %5003 = vmatmul.mubr.msk.f32.gmra.mrb[22].mxu0 %vm584_vm2, %v842_v39  ;;  %v4521_v39 = vld [vmem:[%s6310_s11 + $0x49c] sm:$0xff] }
  0xc3   : > { %5064 = vmatmul.mubr.msk.f32.gmra.mrb[12].mxu1 %vm584_vm2, %v1209_v2  ;;  %5005 = vmatprep.mubr.msk.f32.mxu0 %vm584_vm2, %v843_v42  ;;  %v4448_v2 = vld [vmem:[%s6310_s11 + $0x298] sm:$0xff]  ;;  %v4524_v42 = vld [vmem:[%s6310_s11 + $0x4e4] sm:$0xff] }
  0xc4   : > { %5066 = vmatprep.mubr.msk.f32.mxu1 %vm584_vm2, %v1210_v3  ;;  %v4449_v3 = vld [vmem:[%s6310_s11 + $0x2a0] sm:$0xff] }
  0xc6   : > { %5006 = vmatmul.mubr.msk.f32.gmra.mrb[24].mxu0 %vm584_vm2, %v844_v43  ;;  %v4525_v43 = vld [vmem:[%s6310_s11 + $0x4ec] sm:$0xff] }
  0xc7   : > { %5067 = vmatmul.mubr.msk.f32.gmra.mrb[14].mxu1 %vm584_vm2, %v1211_v5  ;;  %5008 = vmatprep.mubr.msk.f32.mxu0 %vm584_vm2, %v845_v46  ;;  %v4451_v5 = vld [vmem:[%s6310_s11 + $0x2c8] sm:$0xff]  ;;  %v4546_v46 = vld [vmem:[%s6310_s11 + $0x400] sm:$0xff] }
  0xc8   : > { %5071 = vmatprep.mubr.msk.f32.mxu1 %vm584_vm2, %v1426_v6  ;;  %v4452_v6 = vld [vmem:[%s6310_s11 + $0x2e8] sm:$0xff] }
  0xca   : > { %5009 = vmatmul.mubr.msk.f32.gmra.mrb[26].mxu0 %vm584_vm2, %v846_v47  ;;  %v4547_v47 = vld [vmem:[%s6310_s11 + $0x408] sm:$0xff] }
  0xcb   : > { %5072 = vmatmul.mubr.msk.f32.vlgmr.msra.gmra.mrb[0].mxu1 %vm584_vm2, %v1427_v8  ;;  %5011 = vmatprep.mubr.msk.f32.mxu0 %vm584_vm2, %v847_v50  ;;  %v4454_v8 = vld [vmem:[%s6310_s11 + $0x310] sm:$0xff] }
  0xcc   : > { %5096 = vmatpush3.msk.msra.mxu1 %vm633_vm1, %v4422_v55  ;;  %5074 = vmatprep.mubr.msk.f32.mxu1 %vm584_vm2, %v1428_v9  ;;  %v850_v55 = vld [vmem:[%s6310_s11 + $0x120] sm:$0xff]  ;;  %v4455_v9 = vld [vmem:[%s6310_s11 + $0x318] sm:$0xff]  ;;  %v4550_v50 = vld [vmem:[%s6310_s11 + $0x450] sm:$0xff] }
  0xcd   : > { %5121 = vmatprep.subr.msk.mxu1 %vm633_vm1, %v4456_v10 }
  0xce   : > { %5012 = vmatmul.mubr.msk.f32.gmra.mrb[28].mxu0 %vm584_vm2, %v848_v51  ;;  %v4551_v51 = vld [vmem:[%s6310_s11 + $0x458] sm:$0xff] }
  0xcf   : > { %5075 = vmatmul.mubr.msk.f32.gmra.mrb[2].mxu1 %vm584_vm2, %v1429_v11  ;;  %5014 = vmatprep.mubr.msk.f32.mxu0 %vm584_vm2, %v849_v54  ;;  %v4477_v11 = vld [vmem:[%s6310_s11 + $0x3c8] sm:$0xff]  ;;  %v4554_v54 = vld [vmem:[%s6310_s11 + $0x4a0] sm:$0xff] }
  0xd0   : > { %5077 = vmatprep.mubr.msk.f32.mxu1 %vm584_vm2, %v1430_v12  ;;  %v4579_v12 = vld [vmem:[%s7085_s4 + $0x4] sm:$0xf] }
  0xd1   : > { %5225 = vmatprep.subr.msk.mxu0 %vm633_vm1, %v4579_v12 }
  0xd2   : > { %5015 = vmatmul.mubr.msk.f32.gmra.mrb[30].mxu0 %vm584_vm2, %v850_v55  ;;  %v4555_v55 = vld [vmem:[%s6310_s11 + $0x4a8] sm:$0xff] }
  0xd3   : > { %5078 = vmatmul.mubr.msk.f32.gmra.mrb[4].mxu1 %vm584_vm2, %v1431_v13  ;;  %v4478_v13 = vld [vmem:[%s6310_s11 + $0x3e8] sm:$0xff]  ;;  %5226 = vmatpush3.msk.msra.mxu0 %vm633_vm1, %v4579_v12 }
  0xd4   : > { %5080 = vmatprep.mubr.msk.f32.mxu1 %vm584_vm2, %v1432_v14  ;;  %v4560_v14 = vld [vmem:[%s7083_s2 + $0x20] sm:$0xf] }
  0xd7   : > { %5081 = vmatmul.mubr.msk.f32.gmra.mrb[6].mxu1 %vm584_vm2, %v1433_v15  ;;  %v4479_v15 = vld [vmem:[%s6310_s11 + $0x3f0] sm:$0xff] }
  0xd8   : > { %5083 = vmatprep.mubr.msk.f32.mxu1 %vm584_vm2, %v1434_v16  ;;  %v4480_v16 = vld [vmem:[%s6310_s11 + $0x410] sm:$0xff] }
  0xdb   : > { %5084 = vmatmul.mubr.msk.f32.gmra.mrb[8].mxu1 %vm584_vm2, %v1435_v17  ;;  %v4481_v17 = vld [vmem:[%s6310_s11 + $0x418] sm:$0xff] }
  0xdc   : > { %5086 = vmatprep.mubr.msk.f32.mxu1 %vm584_vm2, %v1436_v18  ;;  %v4482_v18 = vld [vmem:[%s6310_s11 + $0x438] sm:$0xff] }
  0xdf   : > { %5087 = vmatmul.mubr.msk.f32.gmra.mrb[10].mxu1 %vm584_vm2, %v1437_v19  ;;  %v4483_v19 = vld [vmem:[%s6310_s11 + $0x440] sm:$0xff] }
  0xe0   : > { %5089 = vmatprep.mubr.msk.f32.mxu1 %vm584_vm2, %v1438_v20  ;;  %v4484_v20 = vld [vmem:[%s6310_s11 + $0x460] sm:$0xff] }
  0xe3   : > { %5090 = vmatmul.mubr.msk.f32.gmra.mrb[12].mxu1 %vm584_vm2, %v1439_v21  ;;  %v4485_v21 = vld [vmem:[%s6310_s11 + $0x468] sm:$0xff] }
  0xe4   : > { %5092 = vmatprep.mubr.msk.f32.mxu1 %vm584_vm2, %v1440_v22  ;;  %v4486_v22 = vld [vmem:[%s6310_s11 + $0x488] sm:$0xff] }
  0xe7   : > { %5093 = vmatmul.mubr.msk.f32.gmra.mrb[14].mxu1 %vm584_vm2, %v1441_v23  ;;  %v4487_v23 = vld [vmem:[%s6310_s11 + $0x490] sm:$0xff] }
  0xe8   : > { %5097 = vmatprep.mubr.msk.f32.mxu1 %vm584_vm2, %v4406_v24  ;;  %v4488_v24 = vld [vmem:[%s6310_s11 + $0x4b0] sm:$0xff] }
  0xeb   : > { %5098 = vmatmul.mubr.msk.f32.vlgmr.msra.gmra.mrb[0].mxu1 %vm584_vm2, %v4407_v27  ;;  %v4491_v27 = vld [vmem:[%s6310_s11 + $0x4e0] sm:$0xff] }
  0xec   : > { %5122 = vmatpush3.msk.msra.mxu1 %vm633_vm1, %v4456_v10  ;;  %5100 = vmatprep.mubr.msk.f32.mxu1 %vm584_vm2, %v4408_v28  ;;  %v4476_v10 = vld [vmem:[%s6310_s11 + $0x3c0] sm:$0xff]  ;;  %v4510_v28 = vld [vmem:[%s6310_s11 + $0x3cc] sm:$0xff] }
  0xed   : > { %5147 = vmatprep.subr.msk.mxu1 %vm633_vm1, %v6439_v29 }
  0xef   : > { %5101 = vmatmul.mubr.msk.f32.gmra.mrb[2].mxu1 %vm584_vm2, %v4409_v32  ;;  %v4514_v32 = vld [vmem:[%s6310_s11 + $0x41c] sm:$0xff] }
  0xf0   : > { %5103 = vmatprep.mubr.msk.f32.mxu1 %vm584_vm2, %v4410_v33  ;;  %v4515_v33 = vld [vmem:[%s6310_s11 + $0x424] sm:$0xff] }
  0xf3   : > { %5104 = vmatmul.mubr.msk.f32.gmra.mrb[4].mxu1 %vm584_vm2, %v4411_v36  ;;  %v4518_v36 = vld [vmem:[%s6310_s11 + $0x46c] sm:$0xff] }
  0xf4   : > { %5106 = vmatprep.mubr.msk.f32.mxu1 %vm584_vm2, %v4412_v37  ;;  %v4519_v37 = vld [vmem:[%s6310_s11 + $0x474] sm:$0xff] }
  0xf7   : > { %5107 = vmatmul.mubr.msk.f32.gmra.mrb[6].mxu1 %vm584_vm2, %v4413_v40  ;;  %v4522_v40 = vld [vmem:[%s6310_s11 + $0x4bc] sm:$0xff] }
  0xf8   : > { %5109 = vmatprep.mubr.msk.f32.mxu1 %vm584_vm2, %v4414_v41  ;;  %v4523_v41 = vld [vmem:[%s6310_s11 + $0x4c4] sm:$0xff] }
  0xfb   : > { %5110 = vmatmul.mubr.msk.f32.gmra.mrb[8].mxu1 %vm584_vm2, %v4415_v44  ;;  %v4544_v44 = vld [vmem:[%s6310_s11 + $0x3d8] sm:$0xff] }
  0xfc   : > { %5112 = vmatprep.mubr.msk.f32.mxu1 %vm584_vm2, %v4416_v45  ;;  %v4545_v45 = vld [vmem:[%s6310_s11 + $0x3e0] sm:$0xff] }
  0xff   : > { %5113 = vmatmul.mubr.msk.f32.gmra.mrb[10].mxu1 %vm584_vm2, %v4417_v48  ;;  %v4548_v48 = vld [vmem:[%s6310_s11 + $0x428] sm:$0xff] }
 0x100   : > { %5115 = vmatprep.mubr.msk.f32.mxu1 %vm584_vm2, %v4418_v49  ;;  %v4549_v49 = vld [vmem:[%s6310_s11 + $0x430] sm:$0xff] }
 0x103   : > { %5116 = vmatmul.mubr.msk.f32.gmra.mrb[12].mxu1 %vm584_vm2, %v4419_v52  ;;  %v4552_v52 = vld [vmem:[%s6310_s11 + $0x478] sm:$0xff] }
 0x104   : > { %5118 = vmatprep.mubr.msk.f32.mxu1 %vm584_vm2, %v4420_v53  ;;  %v4553_v53 = vld [vmem:[%s6310_s11 + $0x480] sm:$0xff] }
 0x107   : > { %5119 = vmatmul.mubr.msk.f32.gmra.mrb[14].mxu1 %vm584_vm2, %v4421_v56  ;;  %v4556_v56 = vld [vmem:[%s6310_s11 + $0x4c8] sm:$0xff] }
 0x108   : > { %5123 = vmatprep.mubr.msk.f32.mxu1 %vm584_vm2, %v4440_v57  ;;  %v4557_v57 = vld [vmem:[%s6310_s11 + $0x4d0] sm:$0xff] }
 0x10b   : > { %5124 = vmatmul.mubr.msk.f32.vlgmr.msra.gmra.mrb[0].mxu1 %vm584_vm2, %v4441_v58  ;;  %v4558_v58 = vld [vmem:[%s6310_s11 + $0x4f0] sm:$0xff] }
 0x10c   : > { %5148 = vmatpush3.msk.msra.mxu1 %vm633_vm1, %v6439_v29  ;;  %5126 = vmatprep.mubr.msk.f32.mxu1 %vm584_vm2, %v4442_v59  ;;  %v4511_v29 = vld [vmem:[%s6310_s11 + $0x3d4] sm:$0xff] }
 0x10d   : > { %5173 = vmatprep.subr.msk.mxu1 %vm633_vm1, %v4526_v60  ;;  %v4559_v59 = vld [vmem:[%s6310_s11 + $0x4f8] sm:$0xff] }
 0x10f   : > { %5127 = vmatmul.mubr.msk.f32.gmra.mrb[2].mxu1 %vm584_vm2, %v4443_v61 }
 0x110   : > { %5129 = vmatprep.mubr.msk.f32.mxu1 %vm584_vm2, %v4444_v62 }
 0x113   : > { %5130 = vmatmul.mubr.msk.f32.gmra.mrb[4].mxu1 %vm584_vm2, %v4445_v63 }
 0x114   : > { %5132 = vmatprep.mubr.msk.f32.mxu1 %vm584_vm2, %v4446_v0 }
 0x117   : > { %5133 = vmatmul.mubr.msk.f32.gmra.mrb[6].mxu1 %vm584_vm2, %v4447_v1 }
 0x118   : > { %5135 = vmatprep.mubr.msk.f32.mxu1 %vm584_vm2, %v4448_v2 }
 0x11b   : > { %5136 = vmatmul.mubr.msk.f32.gmra.mrb[8].mxu1 %vm584_vm2, %v4449_v3 }
 0x11c   : > { %5138 = vmatprep.mubr.msk.f32.mxu1 %vm584_vm2, %v4450_v4 }
 0x11f   : > { %5139 = vmatmul.mubr.msk.f32.gmra.mrb[10].mxu1 %vm584_vm2, %v4451_v5 }
 0x120   : > { %5141 = vmatprep.mubr.msk.f32.mxu1 %vm584_vm2, %v4452_v6 }
 0x123   : > { %5142 = vmatmul.mubr.msk.f32.gmra.mrb[12].mxu1 %vm584_vm2, %v4453_v7 }
 0x124   : > { %5144 = vmatprep.mubr.msk.f32.mxu1 %vm584_vm2, %v4454_v8 }
 0x127   : > { %5145 = vmatmul.mubr.msk.f32.gmra.mrb[14].mxu1 %vm584_vm2, %v4455_v9 }
 0x128   : > { %5149 = vmatprep.mubr.msk.f32.mxu1 %vm584_vm2, %v4476_v10 }
 0x12b   : > { %5150 = vmatmul.mubr.msk.f32.vlgmr.msra.gmra.mrb[0].mxu1 %vm584_vm2, %v4477_v11 }
 0x12c   : > { %5174 = vmatpush3.msk.msra.mxu1 %vm633_vm1, %v4526_v60  ;;  %5152 = vmatprep.mubr.msk.f32.mxu1 %vm584_vm2, %v4478_v13 }
 0x12d   : > { %5199 = vmatprep.subr.msk.mxu1 %vm633_vm1, %v4560_v14 }
 0x12f   : > { %5153 = vmatmul.mubr.msk.f32.gmra.mrb[2].mxu1 %vm584_vm2, %v4479_v15 }
 0x130   : > { %5155 = vmatprep.mubr.msk.f32.mxu1 %vm584_vm2, %v4480_v16 }
 0x133   : > { %5156 = vmatmul.mubr.msk.f32.gmra.mrb[4].mxu1 %vm584_vm2, %v4481_v17 }
 0x134   : > { %5158 = vmatprep.mubr.msk.f32.mxu1 %vm584_vm2, %v4482_v18 }
 0x137   : > { %5159 = vmatmul.mubr.msk.f32.gmra.mrb[6].mxu1 %vm584_vm2, %v4483_v19 }
 0x138   : > { %5161 = vmatprep.mubr.msk.f32.mxu1 %vm584_vm2, %v4484_v20  ;;  %v830_v20 = vld [vmem:[%s7085_s4] sm:$0xf] }
 0x139   : > { %5251 = vmatprep.subr.msk.mxu0 %vm633_vm1, %v830_v20 }
 0x13b   : > { %5162 = vmatmul.mubr.msk.f32.gmra.mrb[8].mxu1 %vm584_vm2, %v4485_v21 }
 0x13c   : > { %5164 = vmatprep.mubr.msk.f32.mxu1 %vm584_vm2, %v4486_v22 }
 0x13f   : > { %5165 = vmatmul.mubr.msk.f32.gmra.mrb[10].mxu1 %vm584_vm2, %v4487_v23 }
 0x140   : > { %5167 = vmatprep.mubr.msk.f32.mxu1 %vm584_vm2, %v4488_v24 }
 0x143   : > { %5168 = vmatmul.mubr.msk.f32.gmra.mrb[12].mxu1 %vm584_vm2, %v4489_v25 }
 0x144   : > { %5170 = vmatprep.mubr.msk.f32.mxu1 %vm584_vm2, %v4490_v26 }
 0x147   : > { %5171 = vmatmul.mubr.msk.f32.gmra.mrb[14].mxu1 %vm584_vm2, %v4491_v27 }
 0x148   : > { %5175 = vmatprep.mubr.msk.f32.mxu1 %vm584_vm2, %v4510_v28 }
 0x14b   : > { %5176 = vmatmul.mubr.msk.f32.vlgmr.msra.gmra.mrb[0].mxu1 %vm584_vm2, %v4511_v29 }
 0x14c   : > { %5200 = vmatpush3.msk.msra.mxu1 %vm633_vm1, %v4560_v14  ;;  %5178 = vmatprep.mubr.msk.f32.mxu1 %vm584_vm2, %v4512_v30  ;;  %v6698_v30 = vld [vmem:[%s7084_s3 + $0x1] ss:$0 sm:$0xff] }
 0x14f   : > { %5179 = vmatmul.mubr.msk.f32.gmra.mrb[2].mxu1 %vm584_vm2, %v4513_v31 }
 0x150   : > { %5181 = vmatprep.mubr.msk.f32.mxu1 %vm584_vm2, %v4514_v32 }
 0x153   : > { %5182 = vmatmul.mubr.msk.f32.gmra.mrb[4].mxu1 %vm584_vm2, %v4515_v33 }
 0x154   : > { %5184 = vmatprep.mubr.msk.f32.mxu1 %vm584_vm2, %v4516_v34 }
 0x157   : > { %5185 = vmatmul.mubr.msk.f32.gmra.mrb[6].mxu1 %vm584_vm2, %v4517_v35 }
 0x158   : > { %5187 = vmatprep.mubr.msk.f32.mxu1 %vm584_vm2, %v4518_v36 }
 0x15b   : > { %5188 = vmatmul.mubr.msk.f32.gmra.mrb[8].mxu1 %vm584_vm2, %v4519_v37 }
 0x15c   : > { %5190 = vmatprep.mubr.msk.f32.mxu1 %vm584_vm2, %v4520_v38 }
 0x15f   : > { %5191 = vmatmul.mubr.msk.f32.gmra.mrb[10].mxu1 %vm584_vm2, %v4521_v39 }
 0x160   : > { %5193 = vmatprep.mubr.msk.f32.mxu1 %vm584_vm2, %v4522_v40 }
 0x163   : > { %5194 = vmatmul.mubr.msk.f32.gmra.mrb[12].mxu1 %vm584_vm2, %v4523_v41 }
 0x164   : > { %5196 = vmatprep.mubr.msk.f32.mxu1 %vm584_vm2, %v4524_v42 }
 0x167   : > { %5197 = vmatmul.mubr.msk.f32.gmra.mrb[14].mxu1 %vm584_vm2, %v4525_v43 }
 0x168   : > { %5201 = vmatprep.mubr.msk.f32.mxu1 %vm584_vm2, %v4544_v44 }
 0x169   : > { %v6645_v60 = vpop.f32.mrb[0].mxu0 }
 0x16a   : > { %v6647_v61 = vpop.f32.mrb[1].mxu0 }
 0x16b   : > { %5202 = vmatmul.mubr.msk.f32.vlgmr.msra.gmra.mrb[0].mxu1 %vm584_vm2, %v4545_v45 }
 0x16c   : > { %5204 = vmatprep.mubr.msk.f32.mxu1 %vm584_vm2, %v4546_v46 }
 0x16d   : > { %v6649_v62 = vpop.f32.mrb[2].mxu0 }
 0x16e   : > { %v6651_v63 = vpop.f32.mrb[3].mxu0 }
 0x16f   : > { %5205 = vmatmul.mubr.msk.f32.gmra.mrb[2].mxu1 %vm584_vm2, %v4547_v47 }
 0x170   : > { %5207 = vmatprep.mubr.msk.f32.mxu1 %vm584_vm2, %v4548_v48 }
 0x171   : > { %v6653_v0 = vpop.f32.mrb[4].mxu0 }
 0x172   : > { %v6655_v1 = vpop.f32.mrb[5].mxu0 }
 0x173   : > { %5208 = vmatmul.mubr.msk.f32.gmra.mrb[4].mxu1 %vm584_vm2, %v4549_v49 }
 0x174   : > { %5210 = vmatprep.mubr.msk.f32.mxu1 %vm584_vm2, %v4550_v50  ;;  %v6708_v50 = vld [vmem:[%s7083_s2 + $0x34] sm:$0xf] }
 0x175   : > { %v6657_v2 = vpop.f32.mrb[6].mxu0 }
 0x176   : > { %v6659_v3 = vpop.f32.mrb[7].mxu0 }
 0x177   : > { %5211 = vmatmul.mubr.msk.f32.gmra.mrb[6].mxu1 %vm584_vm2, %v4551_v51 }
 0x178   : > { %5213 = vmatprep.mubr.msk.f32.mxu1 %vm584_vm2, %v4552_v52 }
 0x179   : > { %v6661_v4 = vpop.f32.mrb[8].mxu0 }
 0x17a   : > { %v6663_v5 = vpop.f32.mrb[9].mxu0 }
 0x17b   : > { %5214 = vmatmul.mubr.msk.f32.gmra.mrb[8].mxu1 %vm584_vm2, %v4553_v53 }
 0x17c   : > { %5216 = vmatprep.mubr.msk.f32.mxu1 %vm584_vm2, %v4554_v54 }
 0x17d   : > { %v6665_v6 = vpop.f32.mrb[10].mxu0 }
 0x17e   : > { %v6667_v7 = vpop.f32.mrb[11].mxu0 }
 0x17f   : > { %5217 = vmatmul.mubr.msk.f32.gmra.mrb[10].mxu1 %vm584_vm2, %v4555_v55 }
 0x180   : > { %5219 = vmatprep.mubr.msk.f32.mxu1 %vm584_vm2, %v4556_v56 }
 0x181   : > { %v6669_v8 = vpop.f32.mrb[12].mxu0 }
 0x182   : > { %v6671_v9 = vpop.f32.mrb[13].mxu0 }
 0x183   : > { %5220 = vmatmul.mubr.msk.f32.gmra.mrb[12].mxu1 %vm584_vm2, %v4557_v57 }
 0x184   : > { %5222 = vmatprep.mubr.msk.f32.mxu1 %vm584_vm2, %v4558_v58 }
 0x185   : > { %v6673_v10 = vpop.f32.mrb[14].mxu0 }
 0x186   : > { %v6675_v11 = vpop.f32.mrb[15].mxu0 }
 0x187   : > { %5223 = vmatmul.mubr.msk.f32.gmra.mrb[14].mxu1 %vm584_vm2, %v4559_v59 }
 0x189   : > { %v4995_v12 = vpop.f32.mrb[16].mxu0 }
 0x18a   : > { %v969_v13 = vpop.f32.mrb[17].mxu0 }
 0x18d   : > { %v4998_v14 = vpop.f32.mrb[18].mxu0 }
 0x18e   : > { %v979_v15 = vpop.f32.mrb[19].mxu0 }
 0x191   : > { %v5001_v16 = vpop.f32.mrb[20].mxu0 }
 0x192   : > { %v989_v17 = vpop.f32.mrb[21].mxu0 }
 0x195   : > { %v5004_v18 = vpop.f32.mrb[22].mxu0 }
 0x196   : > { %v999_v19 = vpop.f32.mrb[23].mxu0 }
 0x199   : > { %v5007_v21 = vpop.f32.mrb[24].mxu0 }
 0x19a   : > { %v6681_v22 = vpop.f32.mrb[25].mxu0 }
 0x19d   : > { %v6683_v23 = vpop.f32.mrb[26].mxu0 }
 0x19e   : > { %v6685_v24 = vpop.f32.mrb[27].mxu0 }
 0x1a1   : > { %v6687_v25 = vpop.f32.mrb[28].mxu0 }
 0x1a2   : > { %v6689_v26 = vpop.f32.mrb[29].mxu0 }
 0x1a5   : > { %v6691_v27 = vpop.f32.mrb[30].mxu0 }
 0x1a6   : > { %v6693_v28 = vpop.f32.mrb[31].mxu0 }
 0x23e   : > { %v5203_v29 = vpop.f32.mrb[0].mxu1 }
 0x23f   : > { %v5381_v31 = vadd.f32 %v5203_v29, %v4995_v12  ;;  %v2717_v32 = vpop.f32.mrb[1].mxu1 }
 0x240   : > { %v5382_v33 = vadd.f32 %v2717_v32, %v969_v13 }
 0x241   : > { %v2818_v34 = vadd.f32 %v5381_v31, %v6698_v30 }
 0x242   : > { %v2817_v35 = vadd.f32 %v5382_v33, %v6698_v30  ;;  %v5206_v36 = vpop.f32.mrb[2].mxu1 }
 0x243   : > { %v2850_v37 = vmul.f32 0.01, %v2818_v34  ;;  %v5383_v38 = vadd.f32 %v5206_v36, %v4998_v14  ;;  %v2727_v39 = vpop.f32.mrb[3].mxu1  ;;  %vm2834_vm3 = vcmp.ge.f32.partialorder %v2818_v34, 0.0 }
 0x244   : > { %v2849_v40 = vmul.f32 0.01, %v2817_v35  ;;  %v5384_v41 = vadd.f32 %v2727_v39, %v979_v15  ;;  %vm2833_vm4 = vcmp.ge.f32.partialorder %v2817_v35, 0.0 }
 0x245   : > { %v2820_v42 = vadd.f32 %v5383_v38, %v6698_v30  ;;  %v2866_v46 = vsel %vm2834_vm3, %v2818_v34, %v2850_v37 }
 0x246   : > { %v2819_v43 = vadd.f32 %v5384_v41, %v6698_v30  ;;  %v5209_v44 = vpop.f32.mrb[4].mxu1  ;;  %v2865_v45 = vsel %vm2833_vm4, %v2817_v35, %v2849_v40 }
 0x247   : > { %v2852_v47 = vmul.f32 0.01, %v2820_v42  ;;  %v5385_v48 = vadd.f32 %v5209_v44, %v5001_v16  ;;  %v2737_v49 = vpop.f32.mrb[5].mxu1  ;;  %5227 = vmatprep.mubr.msk.f32.mxu0 %vm584_vm2, %v2865_v45  ;;  %vm2836_vm6 = vcmp.ge.f32.partialorder %v2820_v42, 0.0 }
 0x248   : > { %v2851_v51 = vmul.f32 0.01, %v2819_v43  ;;  %v5386_v52 = vadd.f32 %v2737_v49, %v989_v17  ;;  %5228 = vmatmul.mubr.msk.f32.vlgmr.msra.gmra.mrb[32].mxu0 %vm584_vm2, %v2866_v46  ;;  %vm2835_vm5 = vcmp.ge.f32.partialorder %v2819_v43, 0.0 }
 0x249   : > { %v2822_v53 = vadd.f32 %v5385_v48, %v6698_v30  ;;  %5252 = vmatpush3.msk.msra.mxu0 %vm633_vm1, %v830_v20  ;;  %v2868_v12 = vsel %vm2836_vm6, %v2820_v42, %v2852_v47 }
 0x24a   : > { %v2821_v54 = vadd.f32 %v5386_v52, %v6698_v30  ;;  %v5212_v55 = vpop.f32.mrb[6].mxu1  ;;  %v2867_v56 = vsel %vm2835_vm5, %v2819_v43, %v2851_v51  ;;  %5277 = vmatprep.subr.msk.mxu0 %vm633_vm1, %v6708_v50 }
 0x24b   : > { %v2854_v57 = vmul.f32 0.01, %v2822_v53  ;;  %v5387_v58 = vadd.f32 %v5212_v55, %v5004_v18  ;;  %v2747_v59 = vpop.f32.mrb[7].mxu1  ;;  %5230 = vmatprep.mubr.msk.f32.mxu0 %vm584_vm2, %v2867_v56  ;;  %vm2838_vm8 = vcmp.ge.f32.partialorder %v2822_v53, 0.0 }
 0x24c   : > { %v2853_v13 = vmul.f32 0.01, %v2821_v54  ;;  %v5388_v14 = vadd.f32 %v2747_v59, %v999_v19  ;;  %5231 = vmatmul.mubr.msk.f32.gmra.mrb[34].mxu0 %vm584_vm2, %v2868_v12  ;;  %vm2837_vm7 = vcmp.ge.f32.partialorder %v2821_v54, 0.0 }
 0x24d   : > { %v2824_v15 = vadd.f32 %v5387_v58, %v6698_v30  ;;  %v2870_v18 = vsel %vm2838_vm8, %v2822_v53, %v2854_v57 }
 0x24e   : > { %v2823_v16 = vadd.f32 %v5388_v14, %v6698_v30  ;;  %v5215_v17 = vpop.f32.mrb[8].mxu1  ;;  %v2869_v20 = vsel %vm2837_vm7, %v2821_v54, %v2853_v13 }
 0x24f   : > { %v2856_v29 = vmul.f32 0.01, %v2824_v15  ;;  %v5389_v31 = vadd.f32 %v5215_v17, %v5007_v21  ;;  %v2757_v32 = vpop.f32.mrb[9].mxu1  ;;  %5233 = vmatprep.mubr.msk.f32.mxu0 %vm584_vm2, %v2869_v20  ;;  %vm2840_vm10 = vcmp.ge.f32.partialorder %v2824_v15, 0.0 }
 0x250   : > { %v2855_v33 = vmul.f32 0.01, %v2823_v16  ;;  %v5390_v34 = vadd.f32 %v2757_v32, %v6681_v22  ;;  %5234 = vmatmul.mubr.msk.f32.gmra.mrb[36].mxu0 %vm584_vm2, %v2870_v18  ;;  %vm2839_vm9 = vcmp.ge.f32.partialorder %v2823_v16, 0.0 }
 0x251   : > { %v2826_v19 = vadd.f32 %v5389_v31, %v6698_v30  ;;  %v2872_v40 = vsel %vm2840_vm10, %v2824_v15, %v2856_v29 }
 0x252   : > { %v2825_v35 = vadd.f32 %v5390_v34, %v6698_v30  ;;  %v5218_v36 = vpop.f32.mrb[10].mxu1  ;;  %v2871_v37 = vsel %vm2839_vm9, %v2823_v16, %v2855_v33 }
 0x253   : > { %v2858_v38 = vmul.f32 0.01, %v2826_v19  ;;  %v5391_v21 = vadd.f32 %v5218_v36, %v6683_v23  ;;  %v2767_v39 = vpop.f32.mrb[11].mxu1  ;;  %5236 = vmatprep.mubr.msk.f32.mxu0 %vm584_vm2, %v2871_v37  ;;  %vm2842_vm12 = vcmp.ge.f32.partialorder %v2826_v19, 0.0 }
 0x254   : > { %v2857_v41 = vmul.f32 0.01, %v2825_v35  ;;  %v5392_v22 = vadd.f32 %v2767_v39, %v6685_v24  ;;  %5237 = vmatmul.mubr.msk.f32.gmra.mrb[38].mxu0 %vm584_vm2, %v2872_v40  ;;  %vm2841_vm11 = vcmp.ge.f32.partialorder %v2825_v35, 0.0  ;;  %v6736_v24 = vld [vmem:[%s7084_s3] ss:$0 sm:$0xff] }
 0x255   : > { %v2828_v42 = vadd.f32 %v5391_v21, %v6698_v30  ;;  %v2874_v48 = vsel %vm2842_vm12, %v2826_v19, %v2858_v38  ;;  %v704_v55 = vadd.f32 %v6736_v24, %v6647_v61  ;;  %v709_v61 = vadd.f32 %v6645_v60, %v6736_v24 }
 0x256   : > { %v2827_v43 = vadd.f32 %v5392_v22, %v6698_v30  ;;  %v5221_v44 = vpop.f32.mrb[12].mxu1  ;;  %v2873_v45 = vsel %vm2841_vm11, %v2825_v35, %v2857_v41  ;;  %v719_v31 = vadd.f32 %v6649_v62, %v6736_v24  ;;  %v724_v18 = vadd.f32 %v6736_v24, %v6655_v1  ;;  %v6768_v62 = vld [vmem:[%s7085_s4 + $0x8] sm:$0xf] }
 0x257   : > { %v2860_v46 = vmul.f32 0.01, %v2828_v42  ;;  %v5393_v23 = vadd.f32 %v5221_v44, %v6687_v25  ;;  %v2777_v47 = vpop.f32.mrb[13].mxu1  ;;  %5239 = vmatprep.mubr.msk.f32.mxu0 %vm584_vm2, %v2873_v45  ;;  %vm2844_vm14 = vcmp.ge.f32.partialorder %v2828_v42, 0.0  ;;  %vm782_vm5 = vcmp.ge.f32.partialorder %v704_v55, 0.0 }
 0x258   : > { %v2859_v49 = vmul.f32 0.01, %v2827_v43  ;;  %v5394_v51 = vadd.f32 %v2777_v47, %v6689_v26  ;;  %5240 = vmatmul.mubr.msk.f32.gmra.mrb[40].mxu0 %vm584_vm2, %v2874_v48  ;;  %vm2843_vm13 = vcmp.ge.f32.partialorder %v2827_v43, 0.0  ;;  %vm783_vm6 = vcmp.ge.f32.partialorder %v709_v61, 0.0 }
 0x259   : > { %v2830_v52 = vadd.f32 %v5393_v23, %v6698_v30  ;;  %v2876_v26 = vsel %vm2844_vm14, %v2828_v42, %v2860_v46  ;;  %v801_v34 = vmul.f32 0.01, %v719_v31  ;;  %v729_v19 = vadd.f32 %v6653_v0, %v6736_v24 }
 0x25a   : > { %v2829_v25 = vadd.f32 %v5394_v51, %v6698_v30  ;;  %v5224_v53 = vpop.f32.mrb[14].mxu1  ;;  %v2875_v54 = vsel %vm2843_vm13, %v2827_v43, %v2859_v49  ;;  %vm785_vm8 = vcmp.ge.f32.partialorder %v719_v31, 0.0  ;;  %v802_v35 = vmul.f32 0.01, %v724_v18 }
 0x25b   : > { %v2862_v56 = vmul.f32 0.01, %v2830_v52  ;;  %v5395_v57 = vadd.f32 %v5224_v53, %v6691_v27  ;;  %v2787_v58 = vpop.f32.mrb[15].mxu1  ;;  %5242 = vmatprep.mubr.msk.f32.mxu0 %vm584_vm2, %v2875_v54  ;;  %vm2846_vm0 = vcmp.ge.f32.partialorder %v2830_v52, 0.0  ;;  %v798_v27 = vmul.f32 0.01, %v704_v55 }
 0x25c   : > { %v2861_v59 = vmul.f32 0.01, %v2829_v25  ;;  %v5396_v12 = vadd.f32 %v2787_v58, %v6693_v28  ;;  %5243 = vmatmul.mubr.msk.f32.gmra.mrb[42].mxu0 %vm584_vm2, %v2876_v26  ;;  %vm2845_vm15 = vcmp.ge.f32.partialorder %v2829_v25, 0.0  ;;  %v714_v28 = vadd.f32 %v6736_v24, %v6651_v63  ;;  %v6810_v54 = vld [vmem:[%s6221_s28] sm:$0xff]  ;;  %v6837_v26 = vld [vmem:[%s6221_s28 + $0x28] sm:$0xff] }
 0x25d   : > { %v2832_v13 = vadd.f32 %v5395_v57, %v6698_v30  ;;  %v2878_v17 = vsel %vm2846_vm0, %v2830_v52, %v2862_v56  ;;  %v814_v63 = vsel %vm782_vm5, %v704_v55, %v798_v27  ;;  %v734_v1 = vadd.f32 %v6736_v24, %v6659_v3  ;;  %v6815_v55 = vld [vmem:[%s6221_s28 + $0x8] sm:$0xff]  ;;  %v6820_v56 = vld [vmem:[%s6221_s28 + $0x10] sm:$0xff]  ;;  %v6827_v57 = vld [vmem:[%s6221_s28 + $0x18] sm:$0xff] }
 0x25e   : > { %v2831_v14 = vadd.f32 %v5396_v12, %v6698_v30  ;;  %v2877_v15 = vsel %vm2845_vm15, %v2829_v25, %v2861_v59  ;;  %v799_v30 = vmul.f32 0.01, %v709_v61  ;;  %v800_v32 = vmul.f32 0.01, %v714_v28  ;;  %v6832_v58 = vld [vmem:[%s6221_s28 + $0x20] sm:$0xff]  ;;  %v6842_v59 = vld [vmem:[%s6221_s28 + $0x30] sm:$0xff] }
 0x25f   : > { %v2864_v16 = vmul.f32 0.01, %v2832_v13  ;;  %5245 = vmatprep.mubr.msk.f32.mxu0 %vm584_vm2, %v2877_v15  ;;  %vm2848_vm4 = vcmp.ge.f32.partialorder %v2832_v13, 0.0  ;;  %vm784_vm7 = vcmp.ge.f32.partialorder %v714_v28, 0.0  ;;  %vm786_vm9 = vcmp.ge.f32.partialorder %v724_v18, 0.0  ;;  %v6847_v12 = vld [vmem:[%s6221_s28 + $0x38] sm:$0xff] }
 0x260   : > { %v2863_v20 = vmul.f32 0.01, %v2831_v14  ;;  %5246 = vmatmul.mubr.msk.f32.gmra.mrb[44].mxu0 %vm584_vm2, %v2878_v17  ;;  %vm2847_vm3 = vcmp.ge.f32.partialorder %v2831_v14, 0.0  ;;  %v815_v33 = vsel %vm783_vm6, %v709_v61, %v799_v30  ;;  %v816_v36 = vsel %vm784_vm7, %v714_v28, %v800_v32  ;;  %v6862_v15 = vld [vmem:[%s6221_s28 + $0x50] sm:$0xff]  ;;  %v6867_v61 = vld [vmem:[%s6221_s28 + $0x58] sm:$0xff]  ;;  %v6872_v27 = vld [vmem:[%s6221_s28 + $0x60] sm:$0xff] }
 0x261   : > { %v2880_v60 = vsel %vm2848_vm4, %v2832_v13, %v2864_v16  ;;  %v803_v0 = vmul.f32 0.01, %v729_v19  ;;  %v739_v37 = vadd.f32 %v6657_v2, %v6736_v24  ;;  %v817_v38 = vsel %vm785_vm8, %v719_v31, %v801_v34  ;;  %v6852_v13 = vld [vmem:[%s6221_s28 + $0x40] sm:$0xff]  ;;  %v6877_v16 = vld [vmem:[%s6221_s28 + $0x68] sm:$0xff]  ;;  %v6882_v17 = vld [vmem:[%s6221_s28 + $0x70] sm:$0xff] }
 0x262   : > { %v2879_v29 = vsel %vm2847_vm3, %v2831_v14, %v2863_v20  ;;  %vm787_vm10 = vcmp.ge.f32.partialorder %v729_v19, 0.0  ;;  %v804_v21 = vmul.f32 0.01, %v734_v1  ;;  %v744_v3 = vadd.f32 %v6736_v24, %v6663_v5  ;;  %v6857_v14 = vld [vmem:[%s6221_s28 + $0x48] sm:$0xff]  ;;  %v6887_v28 = vld [vmem:[%s6221_s28 + $0x78] sm:$0xff] }
 0x263   : > { %5248 = vmatprep.mubr.msk.f32.mxu0 %vm584_vm2, %v2879_v29  ;;  %v818_v39 = vsel %vm786_vm9, %v724_v18, %v802_v35  ;;  %vm788_vm11 = vcmp.ge.f32.partialorder %v734_v1, 0.0  ;;  %v749_v40 = vadd.f32 %v6661_v4, %v6736_v24  ;;  %v819_v41 = vsel %vm787_vm10, %v729_v19, %v803_v0  ;;  %v4651_v20 = vld [vmem:[%s7083_s2 + $0x58] sm:$0xf]  ;;  %v6898_v29 = vld [vmem:[%s7084_s3 + $0x2] ss:$0 sm:$0xff] }
 0x264   : > { %5249 = vmatmul.mubr.msk.f32.gmra.mrb[46].mxu0 %vm584_vm2, %v2880_v60  ;;  %vm789_vm12 = vcmp.ge.f32.partialorder %v739_v37, 0.0  ;;  %v806_v22 = vmul.f32 0.01, %v744_v3  ;;  %v754_v2 = vadd.f32 %v6736_v24, %v6667_v7  ;;  %v820_v42 = vsel %vm788_vm11, %v734_v1, %v804_v21  ;;  %v6908_v0 = vld [vmem:[%s7085_s4 + $0xc] sm:$0xf] }
 0x265   : > { %5253 = vmatprep.mubr.msk.f32.mxu0 %vm584_vm2, %v814_v63  ;;  %vm790_vm13 = vcmp.ge.f32.partialorder %v744_v3, 0.0  ;;  %v807_v5 = vmul.f32 0.01, %v749_v40  ;;  %v759_v43 = vadd.f32 %v6665_v6, %v6736_v24  ;;  %vm791_vm14 = vcmp.ge.f32.partialorder %v749_v40, 0.0 }
 0x266   : > { %v808_v45 = vmul.f32 0.01, %v754_v2  ;;  %v764_v4 = vadd.f32 %v6736_v24, %v6671_v9  ;;  %v822_v46 = vsel %vm790_vm13, %v744_v3, %v806_v22  ;;  %vm792_vm15 = vcmp.ge.f32.partialorder %v754_v2, 0.0 }
 0x267   : > { %v809_v7 = vmul.f32 0.01, %v759_v43  ;;  %v769_v23 = vadd.f32 %v6669_v8, %v6736_v24  ;;  %v823_v47 = vsel %vm791_vm14, %v749_v40, %v807_v5  ;;  %vm793_vm0 = vcmp.ge.f32.partialorder %v759_v43, 0.0 }
 0x268   : > { %5254 = vmatmul.mubr.msk.f32.vlgmr.msra.gmra.mrb[32].mxu0 %vm584_vm2, %v815_v33  ;;  %v810_v48 = vmul.f32 0.01, %v764_v4  ;;  %v774_v6 = vadd.f32 %v6736_v24, %v6675_v11  ;;  %v824_v49 = vsel %vm792_vm15, %v754_v2, %v808_v45  ;;  %vm794_vm3 = vcmp.ge.f32.partialorder %v764_v4, 0.0 }
 0x269   : > { %5278 = vmatpush3.msk.msra.mxu0 %vm633_vm1, %v6708_v50  ;;  %5256 = vmatprep.mubr.msk.f32.mxu0 %vm584_vm2, %v816_v36  ;;  %v805_v50 = vmul.f32 0.01, %v739_v37  ;;  %v811_v9 = vmul.f32 0.01, %v769_v23  ;;  %v779_v51 = vadd.f32 %v6673_v10, %v6736_v24  ;;  %v825_v52 = vsel %vm793_vm0, %v759_v43, %v809_v7 }
 0x26a   : > { %5303 = vmatprep.subr.msk.mxu0 %vm633_vm1, %v6768_v62  ;;  %vm795_vm4 = vcmp.ge.f32.partialorder %v769_v23, 0.0  ;;  %v812_v8 = vmul.f32 0.01, %v774_v6  ;;  %v826_v25 = vsel %vm794_vm3, %v764_v4, %v810_v48  ;;  %vm796_vm5 = vcmp.ge.f32.partialorder %v774_v6, 0.0 }
 0x26b   : > { %v821_v44 = vsel %vm789_vm12, %v739_v37, %v805_v50  ;;  %v813_v11 = vmul.f32 0.01, %v779_v51  ;;  %v827_v53 = vsel %vm795_vm4, %v769_v23, %v811_v9  ;;  %vm797_vm6 = vcmp.ge.f32.partialorder %v779_v51, 0.0 }
 0x26c   : > { %5257 = vmatmul.mubr.msk.f32.gmra.mrb[34].mxu0 %vm584_vm2, %v817_v38  ;;  %v828_v10 = vsel %vm796_vm5, %v774_v6, %v812_v8 }
 0x26d   : > { %5259 = vmatprep.mubr.msk.f32.mxu0 %vm584_vm2, %v818_v39  ;;  %v829_v24 = vsel %vm797_vm6, %v779_v51, %v813_v11 }
 0x270   : > { %5260 = vmatmul.mubr.msk.f32.gmra.mrb[36].mxu0 %vm584_vm2, %v819_v41 }
 0x271   : > { %5262 = vmatprep.mubr.msk.f32.mxu0 %vm584_vm2, %v820_v42 }
 0x274   : > { %5263 = vmatmul.mubr.msk.f32.gmra.mrb[38].mxu0 %vm584_vm2, %v821_v44 }
 0x275   : > { %5265 = vmatprep.mubr.msk.f32.mxu0 %vm584_vm2, %v822_v46 }
 0x278   : > { %5266 = vmatmul.mubr.msk.f32.gmra.mrb[40].mxu0 %vm584_vm2, %v823_v47 }
 0x279   : > { %5268 = vmatprep.mubr.msk.f32.mxu0 %vm584_vm2, %v824_v49 }
 0x27c   : > { %5269 = vmatmul.mubr.msk.f32.gmra.mrb[42].mxu0 %vm584_vm2, %v825_v52 }
 0x27d   : > { %5271 = vmatprep.mubr.msk.f32.mxu0 %vm584_vm2, %v826_v25 }
 0x280   : > { %5272 = vmatmul.mubr.msk.f32.gmra.mrb[44].mxu0 %vm584_vm2, %v827_v53 }
 0x281   : > { %5274 = vmatprep.mubr.msk.f32.mxu0 %vm584_vm2, %v828_v10 }
 0x284   : > { %5275 = vmatmul.mubr.msk.f32.gmra.mrb[46].mxu0 %vm584_vm2, %v829_v24 }
 0x285   : > { %5279 = vmatprep.mubr.msk.f32.mxu0 %vm584_vm2, %v6810_v54 }
 0x288   : > { %5280 = vmatmul.mubr.msk.f32.vlgmr.msra.gmra.mrb[48].mxu0 %vm584_vm2, %v6815_v55 }
 0x289   : > { %5282 = vmatprep.mubr.msk.f32.mxu0 %vm584_vm2, %v6820_v56  ;;  %5304 = vmatpush3.msk.msra.mxu0 %vm633_vm1, %v6768_v62 }
 0x28a   : > { %5329 = vmatprep.subr.msk.mxu0 %vm633_vm1, %v4651_v20 }
 0x28c   : > { %5283 = vmatmul.mubr.msk.f32.gmra.mrb[50].mxu0 %vm584_vm2, %v6827_v57 }
 0x28d   : > { %5285 = vmatprep.mubr.msk.f32.mxu0 %vm584_vm2, %v6832_v58 }
 0x290   : > { %5286 = vmatmul.mubr.msk.f32.gmra.mrb[52].mxu0 %vm584_vm2, %v6837_v26 }
 0x291   : > { %5288 = vmatprep.mubr.msk.f32.mxu0 %vm584_vm2, %v6842_v59 }
 0x294   : > { %5289 = vmatmul.mubr.msk.f32.gmra.mrb[54].mxu0 %vm584_vm2, %v6847_v12 }
 0x295   : > { %5291 = vmatprep.mubr.msk.f32.mxu0 %vm584_vm2, %v6852_v13 }
 0x298   : > { %5292 = vmatmul.mubr.msk.f32.gmra.mrb[56].mxu0 %vm584_vm2, %v6857_v14 }
 0x299   : > { %5294 = vmatprep.mubr.msk.f32.mxu0 %vm584_vm2, %v6862_v15 }
 0x29c   : > { %5295 = vmatmul.mubr.msk.f32.gmra.mrb[58].mxu0 %vm584_vm2, %v6867_v61 }
 0x29d   : > { %5297 = vmatprep.mubr.msk.f32.mxu0 %vm584_vm2, %v6872_v27 }
 0x2a0   : > { %5298 = vmatmul.mubr.msk.f32.gmra.mrb[60].mxu0 %vm584_vm2, %v6877_v16 }
 0x2a1   : > { %5300 = vmatprep.mubr.msk.f32.mxu0 %vm584_vm2, %v6882_v17 }
 0x2a4   : > { %5301 = vmatmul.mubr.msk.f32.gmra.mrb[62].mxu0 %vm584_vm2, %v6887_v28 }
 0x35b   : > { %v5281_v30 = vpop.f32.mrb[48].mxu0 }
 0x35c   : > { %v3357_v31 = vadd.f32 %v5281_v30, %v6898_v29  ;;  %v3351_v60 = vpop.f32.mrb[49].mxu0 }
 0x35d   : > { %v3352_v32 = vadd.f32 %v6898_v29, %v3351_v60 }
 0x35e   : > { %v3447_v18 = vmul.f32 0.01, %v3357_v31  ;;  %vm3431_vm7 = vcmp.ge.f32.partialorder %v3357_v31, 0.0 }
 0x35f   : > { %vm3430_vm8 = vcmp.ge.f32.partialorder %v3352_v32, 0.0  ;;  %v3446_v63 = vmul.f32 0.01, %v3352_v32  ;;  %v5284_v33 = vpop.f32.mrb[50].mxu0 }
 0x360   : > { %v3367_v34 = vadd.f32 %v5284_v33, %v6898_v29  ;;  %v3361_v19 = vpop.f32.mrb[51].mxu0  ;;  %v3463_v1 = vsel %vm3431_vm7, %v3357_v31, %v3447_v18 }
 0x361   : > { %v3362_v62 = vadd.f32 %v6898_v29, %v3361_v19  ;;  %v3462_v35 = vsel %vm3430_vm8, %v3352_v32, %v3446_v63 }
 0x362   : > { %v3449_v36 = vmul.f32 0.01, %v3367_v34  ;;  %5305 = vmatprep.mubr.msk.f32.mxu0 %vm584_vm2, %v3462_v35  ;;  %vm3433_vm9 = vcmp.ge.f32.partialorder %v3367_v34, 0.0 }
 0x363   : > { %vm3432_vm10 = vcmp.ge.f32.partialorder %v3362_v62, 0.0  ;;  %v3448_v37 = vmul.f32 0.01, %v3362_v62  ;;  %v5287_v38 = vpop.f32.mrb[52].mxu0  ;;  %5306 = vmatmul.mubr.msk.f32.vlgmr.msra.gmra.mrb[32].mxu0 %vm584_vm2, %v3463_v1 }
 0x364   : > { %v3377_v21 = vadd.f32 %v5287_v38, %v6898_v29  ;;  %5330 = vmatpush3.msk.msra.mxu0 %vm633_vm1, %v4651_v20  ;;  %v3371_v3 = vpop.f32.mrb[53].mxu0  ;;  %v3465_v41 = vsel %vm3433_vm9, %v3367_v34, %v3449_v36 }
 0x365   : > { %v3372_v39 = vadd.f32 %v6898_v29, %v3371_v3  ;;  %v3464_v50 = vsel %vm3432_vm10, %v3362_v62, %v3448_v37  ;;  %5355 = vmatprep.subr.msk.mxu0 %vm633_vm1, %v6908_v0 }
 0x366   : > { %v3451_v40 = vmul.f32 0.01, %v3377_v21  ;;  %5308 = vmatprep.mubr.msk.f32.mxu0 %vm584_vm2, %v3464_v50  ;;  %vm3435_vm11 = vcmp.ge.f32.partialorder %v3377_v21, 0.0 }
 0x367   : > { %vm3434_vm12 = vcmp.ge.f32.partialorder %v3372_v39, 0.0  ;;  %v3450_v22 = vmul.f32 0.01, %v3372_v39  ;;  %v5290_v2 = vpop.f32.mrb[54].mxu0  ;;  %5309 = vmatmul.mubr.msk.f32.gmra.mrb[34].mxu0 %vm584_vm2, %v3465_v41 }
 0x368   : > { %v3387_v42 = vadd.f32 %v5290_v2, %v6898_v29  ;;  %v3381_v5 = vpop.f32.mrb[55].mxu0  ;;  %v3467_v4 = vsel %vm3435_vm11, %v3377_v21, %v3451_v40 }
 0x369   : > { %v3382_v43 = vadd.f32 %v6898_v29, %v3381_v5  ;;  %v3466_v44 = vsel %vm3434_vm12, %v3372_v39, %v3450_v22 }
 0x36a   : > { %v3453_v45 = vmul.f32 0.01, %v3387_v42  ;;  %5311 = vmatprep.mubr.msk.f32.mxu0 %vm584_vm2, %v3466_v44  ;;  %vm3437_vm13 = vcmp.ge.f32.partialorder %v3387_v42, 0.0 }
 0x36b   : > { %vm3436_vm14 = vcmp.ge.f32.partialorder %v3382_v43, 0.0  ;;  %v3452_v46 = vmul.f32 0.01, %v3382_v43  ;;  %v5293_v7 = vpop.f32.mrb[56].mxu0  ;;  %5312 = vmatmul.mubr.msk.f32.gmra.mrb[36].mxu0 %vm584_vm2, %v3467_v4 }
 0x36c   : > { %v3397_v23 = vadd.f32 %v5293_v7, %v6898_v29  ;;  %v3391_v47 = vpop.f32.mrb[57].mxu0  ;;  %v3469_v9 = vsel %vm3437_vm13, %v3387_v42, %v3453_v45 }
 0x36d   : > { %v3392_v48 = vadd.f32 %v6898_v29, %v3391_v47  ;;  %v3468_v6 = vsel %vm3436_vm14, %v3382_v43, %v3452_v46 }
 0x36e   : > { %v3455_v49 = vmul.f32 0.01, %v3397_v23  ;;  %5314 = vmatprep.mubr.msk.f32.mxu0 %vm584_vm2, %v3468_v6  ;;  %vm3439_vm15 = vcmp.ge.f32.partialorder %v3397_v23, 0.0 }
 0x36f   : > { %vm3438_vm0 = vcmp.ge.f32.partialorder %v3392_v48, 0.0  ;;  %v3454_v51 = vmul.f32 0.01, %v3392_v48  ;;  %v5296_v52 = vpop.f32.mrb[58].mxu0  ;;  %5315 = vmatmul.mubr.msk.f32.gmra.mrb[38].mxu0 %vm584_vm2, %v3469_v9 }
 0x370   : > { %v3407_v8 = vadd.f32 %v5296_v52, %v6898_v29  ;;  %v3401_v25 = vpop.f32.mrb[59].mxu0  ;;  %v3471_v24 = vsel %vm3439_vm15, %v3397_v23, %v3455_v49 }
 0x371   : > { %v3402_v11 = vadd.f32 %v6898_v29, %v3401_v25  ;;  %v3470_v53 = vsel %vm3438_vm0, %v3392_v48, %v3454_v51 }
 0x372   : > { %v3457_v10 = vmul.f32 0.01, %v3407_v8  ;;  %5317 = vmatprep.mubr.msk.f32.mxu0 %vm584_vm2, %v3470_v53  ;;  %vm3441_vm3 = vcmp.ge.f32.partialorder %v3407_v8, 0.0 }
 0x373   : > { %vm3440_vm4 = vcmp.ge.f32.partialorder %v3402_v11, 0.0  ;;  %v3456_v20 = vmul.f32 0.01, %v3402_v11  ;;  %v5299_v30 = vpop.f32.mrb[60].mxu0  ;;  %5318 = vmatmul.mubr.msk.f32.gmra.mrb[40].mxu0 %vm584_vm2, %v3471_v24 }
 0x374   : > { %v3417_v31 = vadd.f32 %v5299_v30, %v6898_v29  ;;  %v3411_v60 = vpop.f32.mrb[61].mxu0  ;;  %v3473_v33 = vsel %vm3441_vm3, %v3407_v8, %v3457_v10 }
 0x375   : > { %v3412_v32 = vadd.f32 %v6898_v29, %v3411_v60  ;;  %v3472_v18 = vsel %vm3440_vm4, %v3402_v11, %v3456_v20 }
 0x376   : > { %v3459_v63 = vmul.f32 0.01, %v3417_v31  ;;  %5320 = vmatprep.mubr.msk.f32.mxu0 %vm584_vm2, %v3472_v18  ;;  %vm3443_vm5 = vcmp.ge.f32.partialorder %v3417_v31, 0.0 }
 0x377   : > { %vm3442_vm6 = vcmp.ge.f32.partialorder %v3412_v32, 0.0  ;;  %v3458_v34 = vmul.f32 0.01, %v3412_v32  ;;  %v5302_v19 = vpop.f32.mrb[62].mxu0  ;;  %5321 = vmatmul.mubr.msk.f32.gmra.mrb[42].mxu0 %vm584_vm2, %v3473_v33 }
 0x378   : > { %v3427_v62 = vadd.f32 %v5302_v19, %v6898_v29  ;;  %v3421_v35 = vpop.f32.mrb[63].mxu0  ;;  %v3475_v38 = vsel %vm3443_vm5, %v3417_v31, %v3459_v63 }
 0x379   : > { %v3422_v1 = vadd.f32 %v6898_v29, %v3421_v35  ;;  %v3474_v36 = vsel %vm3442_vm6, %v3412_v32, %v3458_v34 }
 0x37a   : > { %v3461_v37 = vmul.f32 0.01, %v3427_v62  ;;  %5323 = vmatprep.mubr.msk.f32.mxu0 %vm584_vm2, %v3474_v36  ;;  %vm3445_vm7 = vcmp.ge.f32.partialorder %v3427_v62, 0.0 }
 0x37b   : > { %vm3444_vm8 = vcmp.ge.f32.partialorder %v3422_v1, 0.0  ;;  %v3460_v21 = vmul.f32 0.01, %v3422_v1  ;;  %5324 = vmatmul.mubr.msk.f32.gmra.mrb[44].mxu0 %vm584_vm2, %v3475_v38 }
 0x37c   : > { %v3477_v39 = vsel %vm3445_vm7, %v3427_v62, %v3461_v37 }
 0x37d   : > { %v3476_v3 = vsel %vm3444_vm8, %v3422_v1, %v3460_v21 }
 0x37e   : > { %5326 = vmatprep.mubr.msk.f32.mxu0 %vm584_vm2, %v3476_v3 }
 0x37f   : > { %5327 = vmatmul.mubr.msk.f32.gmra.mrb[46].mxu0 %vm584_vm2, %v3477_v39 }
 0x380   : > { %5331 = vmatprep.mubr.msk.f32.mxu0 %vm584_vm2, %v6810_v54  ;;  %v6977_v54 = vld [vmem:[%s7084_s3 + $0x3] ss:$0 sm:$0xff] }
 0x383   : > { %5332 = vmatmul.mubr.msk.f32.vlgmr.msra.gmra.mrb[64].mxu0 %vm584_vm2, %v6815_v55 }
 0x384   : > { %5334 = vmatprep.mubr.msk.f32.mxu0 %vm584_vm2, %v6820_v56  ;;  %5356 = vmatpush3.msk.msra.mxu0 %vm633_vm1, %v6908_v0 }
 0x387   : > { %5335 = vmatmul.mubr.msk.f32.gmra.mrb[66].mxu0 %vm584_vm2, %v6827_v57 }
 0x388   : > { %5337 = vmatprep.mubr.msk.f32.mxu0 %vm584_vm2, %v6832_v58 }
 0x38b   : > { %5338 = vmatmul.mubr.msk.f32.gmra.mrb[68].mxu0 %vm584_vm2, %v6837_v26 }
 0x38c   : > { %5340 = vmatprep.mubr.msk.f32.mxu0 %vm584_vm2, %v6842_v59 }
 0x38f   : > { %5341 = vmatmul.mubr.msk.f32.gmra.mrb[70].mxu0 %vm584_vm2, %v6847_v12 }
 0x390   : > { %5343 = vmatprep.mubr.msk.f32.mxu0 %vm584_vm2, %v6852_v13 }
 0x393   : > { %5344 = vmatmul.mubr.msk.f32.gmra.mrb[72].mxu0 %vm584_vm2, %v6857_v14 }
 0x394   : > { %5346 = vmatprep.mubr.msk.f32.mxu0 %vm584_vm2, %v6862_v15 }
 0x397   : > { %5347 = vmatmul.mubr.msk.f32.gmra.mrb[74].mxu0 %vm584_vm2, %v6867_v61 }
 0x398   : > { %5349 = vmatprep.mubr.msk.f32.mxu0 %vm584_vm2, %v6872_v27 }
 0x39b   : > { %5350 = vmatmul.mubr.msk.f32.gmra.mrb[76].mxu0 %vm584_vm2, %v6877_v16 }
 0x39c   : > { %5352 = vmatprep.mubr.msk.f32.mxu0 %vm584_vm2, %v6882_v17 }
 0x39f   : > { %5353 = vmatmul.mubr.msk.f32.gmra.mrb[78].mxu0 %vm584_vm2, %v6887_v28 }
 0x456   : > { %v5333_v55 = vpop.f32.mrb[64].mxu0 }
 0x457   : > { %v3774_v56 = vadd.f32 %v5333_v55, %v6977_v54  ;;  %v3768_v57 = vpop.f32.mrb[65].mxu0 }
 0x458   : > { %v3769_v58 = vadd.f32 %v6977_v54, %v3768_v57 }
 0x459   : > { %v3864_v26 = vmul.f32 0.01, %v3774_v56  ;;  %vm3848_vm1 = vcmp.ge.f32.partialorder %v3774_v56, 0.0 }
 0x45a   : > { %vm3847_vm9 = vcmp.ge.f32.partialorder %v3769_v58, 0.0  ;;  %v3863_v59 = vmul.f32 0.01, %v3769_v58  ;;  %v5336_v12 = vpop.f32.mrb[66].mxu0 }
 0x45b   : > { %v3784_v13 = vadd.f32 %v5336_v12, %v6977_v54  ;;  %v3778_v14 = vpop.f32.mrb[67].mxu0  ;;  %v3880_v27 = vsel %vm3848_vm1, %v3774_v56, %v3864_v26 }
 0x45c   : > { %v3779_v15 = vadd.f32 %v6977_v54, %v3778_v14  ;;  %v3879_v61 = vsel %vm3847_vm9, %v3769_v58, %v3863_v59 }
 0x45d   : > { %v3866_v16 = vmul.f32 0.01, %v3784_v13  ;;  %5357 = vmatprep.mubr.msk.f32.mxu0 %vm584_vm2, %v3879_v61  ;;  %vm3850_vm10 = vcmp.ge.f32.partialorder %v3784_v13, 0.0 }
 0x45e   : > { %vm3849_vm11 = vcmp.ge.f32.partialorder %v3779_v15, 0.0  ;;  %v3865_v17 = vmul.f32 0.01, %v3779_v15  ;;  %v5339_v28 = vpop.f32.mrb[68].mxu0  ;;  %5358 = vmatmul.mubr.msk.f32.vlgmr.msra.gmra.mrb[32].mxu0 %vm584_vm2, %v3880_v27 }
 0x45f   : > { %v3794_v29 = vadd.f32 %v5339_v28, %v6977_v54  ;;  %v3788_v0 = vpop.f32.mrb[69].mxu0  ;;  %v3882_v22 = vsel %vm3850_vm10, %v3784_v13, %v3866_v16 }
 0x460   : > { %v3789_v50 = vadd.f32 %v6977_v54, %v3788_v0  ;;  %v3881_v40 = vsel %vm3849_vm11, %v3779_v15, %v3865_v17 }
 0x461   : > { %v3868_v41 = vmul.f32 0.01, %v3794_v29  ;;  %5360 = vmatprep.mubr.msk.f32.mxu0 %vm584_vm2, %v3881_v40  ;;  %vm3852_vm12 = vcmp.ge.f32.partialorder %v3794_v29, 0.0 }
 0x462   : > { %vm3851_vm13 = vcmp.ge.f32.partialorder %v3789_v50, 0.0  ;;  %v3867_v2 = vmul.f32 0.01, %v3789_v50  ;;  %v5342_v42 = vpop.f32.mrb[70].mxu0  ;;  %5361 = vmatmul.mubr.msk.f32.gmra.mrb[34].mxu0 %vm584_vm2, %v3882_v22 }
 0x463   : > { %v3804_v5 = vadd.f32 %v5342_v42, %v6977_v54  ;;  %v3798_v43 = vpop.f32.mrb[71].mxu0  ;;  %v3884_v46 = vsel %vm3852_vm12, %v3794_v29, %v3868_v41 }
 0x464   : > { %v3799_v44 = vadd.f32 %v6977_v54, %v3798_v43  ;;  %v3883_v45 = vsel %vm3851_vm13, %v3789_v50, %v3867_v2 }
 0x465   : > { %v3870_v4 = vmul.f32 0.01, %v3804_v5  ;;  %5363 = vmatprep.mubr.msk.f32.mxu0 %vm584_vm2, %v3883_v45  ;;  %vm3854_vm14 = vcmp.ge.f32.partialorder %v3804_v5, 0.0 }
 0x466   : > { %vm3853_vm15 = vcmp.ge.f32.partialorder %v3799_v44, 0.0  ;;  %v3869_v7 = vmul.f32 0.01, %v3799_v44  ;;  %v5345_v23 = vpop.f32.mrb[72].mxu0  ;;  %5364 = vmatmul.mubr.msk.f32.gmra.mrb[36].mxu0 %vm584_vm2, %v3884_v46 }
 0x467   : > { %v3814_v47 = vadd.f32 %v5345_v23, %v6977_v54  ;;  %v3808_v48 = vpop.f32.mrb[73].mxu0  ;;  %v3886_v51 = vsel %vm3854_vm14, %v3804_v5, %v3870_v4 }
 0x468   : > { %v3809_v6 = vadd.f32 %v6977_v54, %v3808_v48  ;;  %v3885_v49 = vsel %vm3853_vm15, %v3799_v44, %v3869_v7 }
 0x469   : > { %v3872_v9 = vmul.f32 0.01, %v3814_v47  ;;  %5366 = vmatprep.mubr.msk.f32.mxu0 %vm584_vm2, %v3885_v49  ;;  %vm3856_vm0 = vcmp.ge.f32.partialorder %v3814_v47, 0.0 }
 0x46a   : > { %vm3855_vm3 = vcmp.ge.f32.partialorder %v3809_v6, 0.0  ;;  %v3871_v52 = vmul.f32 0.01, %v3809_v6  ;;  %v5348_v8 = vpop.f32.mrb[74].mxu0  ;;  %5367 = vmatmul.mubr.msk.f32.gmra.mrb[38].mxu0 %vm584_vm2, %v3886_v51 }
 0x46b   : > { %v3824_v25 = vadd.f32 %v5348_v8, %v6977_v54  ;;  %v3818_v11 = vpop.f32.mrb[75].mxu0  ;;  %v3888_v20 = vsel %vm3856_vm0, %v3814_v47, %v3872_v9 }
 0x46c   : > { %v3819_v53 = vadd.f32 %v6977_v54, %v3818_v11  ;;  %v3887_v10 = vsel %vm3855_vm3, %v3809_v6, %v3871_v52 }
 0x46d   : > { %v3874_v24 = vmul.f32 0.01, %v3824_v25  ;;  %5369 = vmatprep.mubr.msk.f32.mxu0 %vm584_vm2, %v3887_v10  ;;  %vm3858_vm4 = vcmp.ge.f32.partialorder %v3824_v25, 0.0 }
 0x46e   : > { %vm3857_vm5 = vcmp.ge.f32.partialorder %v3819_v53, 0.0  ;;  %v3873_v30 = vmul.f32 0.01, %v3819_v53  ;;  %v5351_v31 = vpop.f32.mrb[76].mxu0  ;;  %5370 = vmatmul.mubr.msk.f32.gmra.mrb[40].mxu0 %vm584_vm2, %v3888_v20 }
 0x46f   : > { %v3834_v60 = vadd.f32 %v5351_v31, %v6977_v54  ;;  %v3828_v32 = vpop.f32.mrb[77].mxu0  ;;  %v3890_v34 = vsel %vm3858_vm4, %v3824_v25, %v3874_v24 }
 0x470   : > { %v3829_v18 = vadd.f32 %v6977_v54, %v3828_v32  ;;  %v3889_v63 = vsel %vm3857_vm5, %v3819_v53, %v3873_v30 }
 0x471   : > { %v3876_v33 = vmul.f32 0.01, %v3834_v60  ;;  %5372 = vmatprep.mubr.msk.f32.mxu0 %vm584_vm2, %v3889_v63  ;;  %vm3860_vm6 = vcmp.ge.f32.partialorder %v3834_v60, 0.0 }
 0x472   : > { %vm3859_vm7 = vcmp.ge.f32.partialorder %v3829_v18, 0.0  ;;  %v3875_v19 = vmul.f32 0.01, %v3829_v18  ;;  %v5354_v62 = vpop.f32.mrb[78].mxu0  ;;  %5373 = vmatmul.mubr.msk.f32.gmra.mrb[42].mxu0 %vm584_vm2, %v3890_v34 }
 0x473   : > { %v3844_v35 = vadd.f32 %v5354_v62, %v6977_v54  ;;  %v3838_v1 = vpop.f32.mrb[79].mxu0  ;;  %v3892_v21 = vsel %vm3860_vm6, %v3834_v60, %v3876_v33 }
 0x474   : > { %v3839_v36 = vadd.f32 %v6977_v54, %v3838_v1  ;;  %v3891_v37 = vsel %vm3859_vm7, %v3829_v18, %v3875_v19  ;;  %v7016_v54 = vld [vmem:[%s278_s8] ss:$0 sm:$0xff] }
 0x475   : > { %v3878_v38 = vmul.f32 0.01, %v3844_v35  ;;  %5375 = vmatprep.mubr.msk.f32.mxu0 %vm584_vm2, %v3891_v37  ;;  %vm3862_vm8 = vcmp.ge.f32.partialorder %v3844_v35, 0.0 }
 0x476   : > { %vm3861_vm1 = vcmp.ge.f32.partialorder %v3839_v36, 0.0  ;;  %v3877_v3 = vmul.f32 0.01, %v3839_v36  ;;  %5376 = vmatmul.mubr.msk.f32.gmra.mrb[44].mxu0 %vm584_vm2, %v3892_v21 }
 0x477   : > { %v3894_v55 = vsel %vm3862_vm8, %v3844_v35, %v3878_v38 }
 0x478   : > { %v3893_v39 = vsel %vm3861_vm1, %v3839_v36, %v3877_v3 }
 0x479   : > { %5378 = vmatprep.mubr.msk.f32.mxu0 %vm584_vm2, %v3893_v39 }
 0x47a   : > { %5379 = vmatmul.mubr.msk.f32.gmra.mrb[46].mxu0 %vm584_vm2, %v3894_v55 }
 0x531   : > { %v5359_v56 = vpop.f32.mrb[32].mxu0 }
 0x532   : > { %v4117_v57 = vadd.f32 %v5359_v56, %v7016_v54  ;;  %v4014_v58 = vpop.f32.mrb[33].mxu0 }
 0x533   : > { %v4116_v26 = vadd.f32 %v7016_v54, %v4014_v58 }
 0x534   : > { %vm4133_vm9 = vcmp.ge.f32.partialorder %v4117_v57, 0.0  ;;  %v4149_v59 = vmul.f32 0.01, %v4117_v57 }
 0x535   : > { %vm4132_vm10 = vcmp.ge.f32.partialorder %v4116_v26, 0.0  ;;  %v4148_v12 = vmul.f32 0.01, %v4116_v26  ;;  %v5362_v13 = vpop.f32.mrb[34].mxu0 }
 0x536   : > { %v4165_v14 = vsel %vm4133_vm9, %v4117_v57, %v4149_v59  ;;  %v4119_v15 = vadd.f32 %v5362_v13, %v7016_v54  ;;  %v4024_v61 = vpop.f32.mrb[35].mxu0 }
 0x537   : > { %4181 = vst.msk [vmem:[%s5739_s17 + $0x8] sm:$0xff] %vm584_vm2, %v4165_v14  ;;  %v4164_v27 = vsel %vm4132_vm10, %v4116_v26, %v4148_v12  ;;  %v4118_v16 = vadd.f32 %v7016_v54, %v4024_v61 }
 0x538   : > { %4180 = vst.msk [vmem:[%s5739_s17] sm:$0xff] %vm584_vm2, %v4164_v27  ;;  %vm4135_vm11 = vcmp.ge.f32.partialorder %v4119_v15, 0.0  ;;  %v4151_v17 = vmul.f32 0.01, %v4119_v15 }
 0x539   : > { %vm4134_vm12 = vcmp.ge.f32.partialorder %v4118_v16, 0.0  ;;  %v4150_v28 = vmul.f32 0.01, %v4118_v16  ;;  %v5365_v29 = vpop.f32.mrb[36].mxu0 }
 0x53a   : > { %v4167_v0 = vsel %vm4135_vm11, %v4119_v15, %v4151_v17  ;;  %v4121_v50 = vadd.f32 %v5365_v29, %v7016_v54  ;;  %v4034_v40 = vpop.f32.mrb[37].mxu0 }
 0x53b   : > { %4183 = vst.msk [vmem:[%s5739_s17 + $0x18] sm:$0xff] %vm584_vm2, %v4167_v0  ;;  %v4166_v41 = vsel %vm4134_vm12, %v4118_v16, %v4150_v28  ;;  %v4120_v22 = vadd.f32 %v7016_v54, %v4034_v40 }
 0x53c   : > { %4182 = vst.msk [vmem:[%s5739_s17 + $0x10] sm:$0xff] %vm584_vm2, %v4166_v41  ;;  %vm4137_vm13 = vcmp.ge.f32.partialorder %v4121_v50, 0.0  ;;  %v4153_v2 = vmul.f32 0.01, %v4121_v50 }
 0x53d   : > { %vm4136_vm14 = vcmp.ge.f32.partialorder %v4120_v22, 0.0  ;;  %v4152_v42 = vmul.f32 0.01, %v4120_v22  ;;  %v5368_v5 = vpop.f32.mrb[38].mxu0 }
 0x53e   : > { %v4169_v43 = vsel %vm4137_vm13, %v4121_v50, %v4153_v2  ;;  %v4123_v44 = vadd.f32 %v5368_v5, %v7016_v54  ;;  %v4044_v45 = vpop.f32.mrb[39].mxu0 }
 0x53f   : > { %4185 = vst.msk [vmem:[%s5739_s17 + $0x28] sm:$0xff] %vm584_vm2, %v4169_v43  ;;  %v4168_v4 = vsel %vm4136_vm14, %v4120_v22, %v4152_v42  ;;  %v4122_v46 = vadd.f32 %v7016_v54, %v4044_v45 }
 0x540   : > { %4184 = vst.msk [vmem:[%s5739_s17 + $0x20] sm:$0xff] %vm584_vm2, %v4168_v4  ;;  %vm4139_vm15 = vcmp.ge.f32.partialorder %v4123_v44, 0.0  ;;  %v4155_v7 = vmul.f32 0.01, %v4123_v44 }
 0x541   : > { %vm4138_vm0 = vcmp.ge.f32.partialorder %v4122_v46, 0.0  ;;  %v4154_v23 = vmul.f32 0.01, %v4122_v46  ;;  %v5371_v47 = vpop.f32.mrb[40].mxu0 }
 0x542   : > { %v4171_v48 = vsel %vm4139_vm15, %v4123_v44, %v4155_v7  ;;  %v4125_v6 = vadd.f32 %v5371_v47, %v7016_v54  ;;  %v4054_v49 = vpop.f32.mrb[41].mxu0 }
 0x543   : > { %4187 = vst.msk [vmem:[%s5739_s17 + $0x38] sm:$0xff] %vm584_vm2, %v4171_v48  ;;  %v4170_v9 = vsel %vm4138_vm0, %v4122_v46, %v4154_v23  ;;  %v4124_v51 = vadd.f32 %v7016_v54, %v4054_v49 }
 0x544   : > { %4186 = vst.msk [vmem:[%s5739_s17 + $0x30] sm:$0xff] %vm584_vm2, %v4170_v9  ;;  %vm4141_vm3 = vcmp.ge.f32.partialorder %v4125_v6, 0.0  ;;  %v4157_v52 = vmul.f32 0.01, %v4125_v6 }
 0x545   : > { %vm4140_vm4 = vcmp.ge.f32.partialorder %v4124_v51, 0.0  ;;  %v4156_v8 = vmul.f32 0.01, %v4124_v51  ;;  %v5374_v25 = vpop.f32.mrb[42].mxu0 }
 0x546   : > { %v4173_v11 = vsel %vm4141_vm3, %v4125_v6, %v4157_v52  ;;  %v4127_v53 = vadd.f32 %v5374_v25, %v7016_v54  ;;  %v4064_v10 = vpop.f32.mrb[43].mxu0 }
 0x547   : > { %4189 = vst.msk [vmem:[%s5739_s17 + $0x48] sm:$0xff] %vm584_vm2, %v4173_v11  ;;  %v4172_v24 = vsel %vm4140_vm4, %v4124_v51, %v4156_v8  ;;  %v4126_v20 = vadd.f32 %v7016_v54, %v4064_v10 }
 0x548   : > { %4188 = vst.msk [vmem:[%s5739_s17 + $0x40] sm:$0xff] %vm584_vm2, %v4172_v24  ;;  %vm4143_vm5 = vcmp.ge.f32.partialorder %v4127_v53, 0.0  ;;  %v4159_v30 = vmul.f32 0.01, %v4127_v53 }
 0x549   : > { %vm4142_vm6 = vcmp.ge.f32.partialorder %v4126_v20, 0.0  ;;  %v4158_v31 = vmul.f32 0.01, %v4126_v20  ;;  %v5377_v60 = vpop.f32.mrb[44].mxu0 }
 0x54a   : > { %v4175_v32 = vsel %vm4143_vm5, %v4127_v53, %v4159_v30  ;;  %v4129_v18 = vadd.f32 %v5377_v60, %v7016_v54  ;;  %v4074_v63 = vpop.f32.mrb[45].mxu0 }
 0x54b   : > { %4191 = vst.msk [vmem:[%s5739_s17 + $0x58] sm:$0xff] %vm584_vm2, %v4175_v32  ;;  %v4174_v33 = vsel %vm4142_vm6, %v4126_v20, %v4158_v31  ;;  %v4128_v34 = vadd.f32 %v7016_v54, %v4074_v63 }
 0x54c   : > { %4190 = vst.msk [vmem:[%s5739_s17 + $0x50] sm:$0xff] %vm584_vm2, %v4174_v33  ;;  %vm4145_vm7 = vcmp.ge.f32.partialorder %v4129_v18, 0.0  ;;  %v4161_v19 = vmul.f32 0.01, %v4129_v18 }
 0x54d   : > { %vm4144_vm8 = vcmp.ge.f32.partialorder %v4128_v34, 0.0  ;;  %v4160_v62 = vmul.f32 0.01, %v4128_v34  ;;  %v5380_v35 = vpop.f32.mrb[46].mxu0 }
 0x54e   : > { %v4177_v1 = vsel %vm4145_vm7, %v4129_v18, %v4161_v19  ;;  %v4131_v36 = vadd.f32 %v5380_v35, %v7016_v54  ;;  %v4084_v37 = vpop.f32.mrb[47].mxu0 }
 0x54f   : > { %4193 = vst.msk [vmem:[%s5739_s17 + $0x68] sm:$0xff] %vm584_vm2, %v4177_v1  ;;  %v4176_v38 = vsel %vm4144_vm8, %v4128_v34, %v4160_v62  ;;  %v4130_v21 = vadd.f32 %v7016_v54, %v4084_v37 }
 0x550   : > { %4192 = vst.msk [vmem:[%s5739_s17 + $0x60] sm:$0xff] %vm584_vm2, %v4176_v38  ;;  %vm4147_vm1 = vcmp.ge.f32.partialorder %v4131_v36, 0.0  ;;  %v4163_v3 = vmul.f32 0.01, %v4131_v36 }
 0x551   : > { %vm4146_vm9 = vcmp.ge.f32.partialorder %v4130_v21, 0.0  ;;  %v4162_v39 = vmul.f32 0.01, %v4130_v21 }
 0x552   : > { %v4179_v55 = vsel %vm4147_vm1, %v4131_v36, %v4163_v3 }
 0x553   : > { %4195 = vst.msk [vmem:[%s5739_s17 + $0x78] sm:$0xff] %vm584_vm2, %v4179_v55  ;;  %v4178_v56 = vsel %vm4146_vm9, %v4130_v21, %v4162_v39 }
 0x554   : > { %4194 = vst.msk [vmem:[%s5739_s17 + $0x70] sm:$0xff] %vm584_vm2, %v4178_v56 }
 0x555 PF: > { %s16_s25 = sadd.s32 1, %s5652_s25   ;;  %s7088_s21 = smov %s5644_s23 }
 0x556   : > { %p13_p8 = scmp.ge.s32.totalorder %s16_s25, 6   ;;  %s7089_s22 = smov %s5648_s24 }
 0x557   : > { %s7090_s23 = smov %s7093_s26  ;;  %s7091_s24 = smov %s7097_s27 }
 0x558   :  { %15 = sbr.rel (!%p13_p8) target bundleno = 3 (0x3), region = 99 }

</bundles_post_ra>
